<compile_context>
chip_gen: v5e
topology: v5e:2x2
jax: 0.10.0
libtpu: 0.0.40
codegen_flags: <defaults>
</compile_context>

<pallas_src>
import functools

import jax
import jax.numpy as jnp
from jax.experimental import pallas as pl
from jax.experimental.pallas import tpu as pltpu

_LANE = 128


def _rup(n, m=_LANE):
    return ((n + m - 1) // m) * m


# ----------------------------------------------------------------------------
# Pallas kernel (one grid step per batch element)
# ----------------------------------------------------------------------------
def _fvae_encoder_kernel(xcol_ref, np_ref, cond_ref, noise_ref,
                         pre_w_ref, pre_b_ref,
                         in_w_ref, wn_b_ref, cond_w_ref,
                         rs_w_ref, rs_b_ref,
                         out_w_ref, out_b_ref,
                         out_ref,
                         xpad_ref,
                         *, n_layers, kernel_size, hp, lp):
    pad = (kernel_size - 1) // 2
    T = xcol_ref.shape[1]

    npad = np_ref[0]                                      # (T, 1) f32
    mask = jnp.broadcast_to(npad, (T, hp))                # hoisted broadcast, reused below

    # pre_net: strided Conv1d as one lane-dense im2col matmul (bf16 operands, f32 acc)
    x = jnp.dot(xcol_ref[0], pre_w_ref[...],
                preferred_element_type=jnp.float32) + pre_b_ref[...]
    x = x * mask                                          # (T, Hp) f32

    cond = cond_ref[0]                                    # (T, Ccp) bf16

    # zero the conv scratch once -> halo rows stay zero across all layers
    xpad_ref[...] = jnp.zeros_like(xpad_ref)

    skip_acc = jnp.zeros((T, hp), jnp.float32)
    for i in range(n_layers):
        # stage current activations into the padded scratch; taps are free static slices
        xpad_ref[pad:pad + T, :] = x.astype(jnp.bfloat16)
        win = jnp.concatenate(
            [xpad_ref[j:j + T, :] for j in range(kernel_size)], axis=-1)  # (T, K*Hp) bf16

        # fused [tanh | sigmoid] in_layer conv (one K*Hp-deep matmul) + fused cond_layer
        ts = jnp.dot(win, in_w_ref[i], preferred_element_type=jnp.float32)
        ts = ts + jnp.dot(cond, cond_w_ref[i], preferred_element_type=jnp.float32)
        ts = ts + wn_b_ref[i]
        acts = jnp.tanh(ts[:, :hp]) * jax.nn.sigmoid(ts[:, hp:])          # (T, Hp) f32

        # fused [res | skip] 1x1 conv (last layer's res half is zeroed in the weights)
        rs = jnp.dot(acts.astype(jnp.bfloat16), rs_w_ref[i],
                     preferred_element_type=jnp.float32) + rs_b_ref[i]
        x = (x + rs[:, :hp]) * mask
        skip_acc = skip_acc + rs[:, hp:]

    out = skip_acc * mask                                 # mask is 0/1 -> single multiply

    # out_proj 1x1 conv, [m | logs] fused, then reparameterize with provided noise
    ml = jnp.dot(out.astype(jnp.bfloat16), out_w_ref[...],
                 preferred_element_type=jnp.float32) + out_b_ref[...]
    m = ml[:, :lp]
    logs = ml[:, lp:]
    z = m + noise_ref[0] * jnp.exp(logs)

    # one lane-dense output slab per batch element: [z | m | logs]
    out_ref[0] = jnp.concatenate([z, m, logs], axis=-1)


# ----------------------------------------------------------------------------
# JAX glue
# ----------------------------------------------------------------------------
def _im2col_strided(x, kernel, stride, pad):
    """x: (B, Cin, T) -> (B, Tout, Cin*kernel), flattened (c, j) to match pre_w rows."""
    B, Cin, T = x.shape
    xp = jnp.pad(x, ((0, 0), (0, 0), (pad, pad)))
    Tout = (T + 2 * pad - kernel) // stride + 1
    cols = [xp[:, :, j:j + stride * (Tout - 1) + 1:stride] for j in range(kernel)]
    col = jnp.stack(cols, axis=3)            # (B, Cin, Tout, kernel)
    col = jnp.transpose(col, (0, 2, 1, 3))   # (B, Tout, Cin, kernel)
    return col.reshape(B, Tout, Cin * kernel).astype(jnp.float32)


def _pack_params(params, *, kernel_size, n_layers):
    """Zero-pad channel dims to 128 lanes and fuse paired weight matrices."""
    H = params["out_m_w"].shape[0]
    L = params["out_m_w"].shape[1]
    Cc = params["cond_w_t"].shape[1]
    Cpre = params["pre_w"].shape[0]
    K = kernel_size
    Hp, Lp, Ccp, Cprep = _rup(H), _rup(L), _rup(Cc), _rup(Cpre)
    f32, bf16 = jnp.float32, jnp.bfloat16

    pre_w = jnp.zeros((Cprep, Hp), f32).at[:Cpre, :H].set(params["pre_w"])
    pre_b = jnp.zeros((1, Hp), f32).at[:, :H].set(params["pre_b"])

    # per-layer im2col weight: rows = tap-major padded channels, cols = [tanh | sigmoid]
    in_w = jnp.zeros((n_layers, K * Hp, 2 * Hp), f32)
    for j in range(K):
        in_w = in_w.at[:, j * Hp:j * Hp + H, :H].set(params["in_w_t"][:, j])
        in_w = in_w.at[:, j * Hp:j * Hp + H, Hp:Hp + H].set(params["in_w_s"][:, j])

    wn_b = jnp.zeros((n_layers, 1, 2 * Hp), f32)
    wn_b = wn_b.at[:, :, :H].set(params["in_b_t"] + params["cond_b_t"])
    wn_b = wn_b.at[:, :, Hp:Hp + H].set(params["in_b_s"] + params["cond_b_s"])

    cond_w = jnp.zeros((n_layers, Ccp, 2 * Hp), f32)
    cond_w = cond_w.at[:, :Cc, :H].set(params["cond_w_t"])
    cond_w = cond_w.at[:, :Cc, Hp:Hp + H].set(params["cond_w_s"])

    rs_w = jnp.zeros((n_layers, Hp, 2 * Hp), f32)
    rs_w = rs_w.at[:, :H, :H].set(params["rs_res_w"])
    rs_w = rs_w.at[:, :H, Hp:Hp + H].set(params["rs_skip_w"])
    rs_b = jnp.zeros((n_layers, 1, 2 * Hp), f32)
    rs_b = rs_b.at[:, :, :H].set(params["rs_res_b"])
    rs_b = rs_b.at[:, :, Hp:Hp + H].set(params["rs_skip_b"])

    out_w = jnp.zeros((Hp, 2 * Lp), f32)
    out_w = out_w.at[:H, :L].set(params["out_m_w"])
    out_w = out_w.at[:H, Lp:Lp + L].set(params["out_s_w"])
    out_b = jnp.zeros((1, 2 * Lp), f32)
    out_b = out_b.at[:, :L].set(params["out_m_b"])
    out_b = out_b.at[:, Lp:Lp + L].set(params["out_s_b"])

    packed = dict(
        pre_w=pre_w.astype(bf16), pre_b=pre_b,
        in_w=in_w.astype(bf16), wn_b=wn_b, cond_w=cond_w.astype(bf16),
        rs_w=rs_w.astype(bf16), rs_b=rs_b,
        out_w=out_w.astype(bf16), out_b=out_b)
    dims = dict(H=H, L=L, Cc=Cc, Cpre=Cpre, Hp=Hp, Lp=Lp, Ccp=Ccp, Cprep=Cprep)
    return packed, dims


def fvae_encoder_forward(x, nonpadding, cond, noise, params, *,
                         stride, kernel_size, n_layers):
    B, c_in, T = x.shape
    K_pre = 2 * stride
    pad0 = stride // 2
    Tout = (T + 2 * pad0 - K_pre) // stride + 1
    pad = (kernel_size - 1) // 2

    packed, d = _pack_params(params, kernel_size=kernel_size, n_layers=n_layers)
    Hp, Lp, Ccp, Cprep, L = d["Hp"], d["Lp"], d["Ccp"], d["Cprep"], d["L"]

    # TODO(synk): pre_net im2col stays host-side; an in-kernel strided-pl.ds conv would cut
    # its HBM input traffic by K_pre for production-length sequences.
    xcol = _im2col_strided(x, K_pre, stride, pad0)                       # (B, Tout, Cpre)
    xcol = jnp.pad(xcol, ((0, 0), (0, 0), (0, Cprep - d["Cpre"]))).astype(jnp.bfloat16)

    np_ds = nonpadding[:, :, ::stride][:, :, :Tout]                      # (B, 1, Tout) returned
    npad = jnp.transpose(np_ds, (0, 2, 1)).astype(jnp.float32)           # (B, Tout, 1)

    cond_t = jnp.transpose(cond, (0, 2, 1)).astype(jnp.float32)          # (B, Tout, Cc)
    cond_t = jnp.pad(cond_t, ((0, 0), (0, 0), (0, Ccp - d["Cc"]))).astype(jnp.bfloat16)

    noise_p = jnp.pad(noise.astype(jnp.float32), ((0, 0), (0, 0), (0, Lp - L)))

    data_in = [xcol, npad, cond_t, noise_p]
    weight_names = ["pre_w", "pre_b", "in_w", "wn_b", "cond_w",
                    "rs_w", "rs_b", "out_w", "out_b"]
    weights = [packed[k] for k in weight_names]

    def bspec(shape):
        nd = len(shape)
        return pl.BlockSpec((1,) + tuple(shape[1:]),
                            lambda b, _n=nd: (b,) + (0,) * (_n - 1))

    def wspec(shape):
        nd = len(shape)
        # TODO(synk): single-buffer these constant-index weight blocks (pl.Buffered(1)) to
        # halve their VMEM footprint on v7x's 64 MiB once stable on the target jax version.
        return pl.BlockSpec(tuple(shape), lambda b, _n=nd: (0,) * _n)

    in_specs = [bspec(a.shape) for a in data_in] + [wspec(w.shape) for w in weights]
    out_shape = jax.ShapeDtypeStruct((B, Tout, 3 * Lp), jnp.float32)
    out_specs = bspec((B, Tout, 3 * Lp))

    kernel = functools.partial(_fvae_encoder_kernel, n_layers=n_layers,
                               kernel_size=kernel_size, hp=Hp, lp=Lp)

    out = pl.pallas_call(
        kernel,
        out_shape=out_shape,
        grid_spec=pltpu.PrefetchScalarGridSpec(
            num_scalar_prefetch=0,
            grid=(B,),
            in_specs=in_specs,
            out_specs=out_specs,
            scratch_shapes=[pltpu.VMEM((Tout + 2 * pad, Hp), jnp.bfloat16)]),
        compiler_params=pltpu.CompilerParams(dimension_semantics=("parallel",)),
    )(*data_in, *weights)

    z = out[:, :, 0:L]
    m = out[:, :, Lp:Lp + L]
    logs = out[:, :, 2 * Lp:2 * Lp + L]
    return z, m, logs, np_ds


# ----------------------------------------------------------------------------
# Deterministic parameter init (shapes follow the PyTorch module; weight_norm is a
# reparameterization, so effective weights are just these tensors)
# ----------------------------------------------------------------------------
def init_params(key, c_in, hidden, c_latent, kernel_size, n_layers, c_cond, stride):
    K_pre = 2 * stride
    keys = jax.random.split(key, 18)

    def w(k, shape, fan_in):
        return jax.random.normal(k, shape, jnp.float32) / jnp.sqrt(float(fan_in))

    p = {}
    p["pre_w"] = w(keys[0], (c_in * K_pre, hidden), c_in * K_pre)
    p["pre_b"] = w(keys[1], (1, hidden), hidden)
    p["in_w_t"] = w(keys[2], (n_layers, kernel_size, hidden, hidden), hidden * kernel_size)
    p["in_w_s"] = w(keys[3], (n_layers, kernel_size, hidden, hidden), hidden * kernel_size)
    p["in_b_t"] = w(keys[4], (n_layers, 1, hidden), hidden)
    p["in_b_s"] = w(keys[5], (n_layers, 1, hidden), hidden)
    p["cond_w_t"] = w(keys[6], (n_layers, c_cond, hidden), c_cond)
    p["cond_w_s"] = w(keys[7], (n_layers, c_cond, hidden), c_cond)
    p["cond_b_t"] = w(keys[8], (n_layers, 1, hidden), hidden)
    p["cond_b_s"] = w(keys[9], (n_layers, 1, hidden), hidden)
    rs_res_w = w(keys[10], (n_layers, hidden, hidden), hidden)
    rs_res_b = w(keys[11], (n_layers, 1, hidden), hidden)
    # last WN layer only produces the H skip channels -> residual branch is inert
    p["rs_res_w"] = rs_res_w.at[-1].set(0.0)
    p["rs_res_b"] = rs_res_b.at[-1].set(0.0)
    p["rs_skip_w"] = w(keys[12], (n_layers, hidden, hidden), hidden)
    p["rs_skip_b"] = w(keys[13], (n_layers, 1, hidden), hidden)
    p["out_m_w"] = w(keys[14], (hidden, c_latent), hidden)
    p["out_m_b"] = w(keys[15], (1, c_latent), c_latent)
    # keep logs well-scaled so exp(logs) stays tame in the test harness
    p["out_s_w"] = 0.1 * w(keys[16], (hidden, c_latent), hidden)
    p["out_s_b"] = 0.1 * w(keys[17], (1, c_latent), c_latent)
    return p


# ----------------------------------------------------------------------------
# Pure-JAX f32 reference (independent implementation of the same math)
# ----------------------------------------------------------------------------
def ref_forward(x, nonpadding, cond, noise, params, *, stride, kernel_size, n_layers):
    B, c_in, T = x.shape
    K_pre = 2 * stride
    pad0 = stride // 2
    Tout = (T + 2 * pad0 - K_pre) // stride + 1

    xcol = _im2col_strided(x, K_pre, stride, pad0)
    npad = jnp.transpose(nonpadding[:, :, ::stride][:, :, :Tout], (0, 2, 1))
    condT = jnp.transpose(cond, (0, 2, 1))

    h = jnp.einsum('btc,cd->btd', xcol, params["pre_w"]) + params["pre_b"][None]
    h = h * npad

    pad = (kernel_size - 1) // 2
    output = jnp.zeros_like(h)
    for i in range(n_layers):
        hp = jnp.pad(h, ((0, 0), (pad, pad), (0, 0)))
        win = jnp.stack([hp[:, j:j + Tout] for j in range(kernel_size)], axis=2)  # (B,T,K,H)
        xt = jnp.einsum('btkh,kho->bto', win, params["in_w_t"][i]) + params["in_b_t"][i][None]
        xs = jnp.einsum('btkh,kho->bto', win, params["in_w_s"][i]) + params["in_b_s"][i][None]
        ct = jnp.einsum('btc,co->bto', condT, params["cond_w_t"][i]) + params["cond_b_t"][i][None]
        cs = jnp.einsum('btc,co->bto', condT, params["cond_w_s"][i]) + params["cond_b_s"][i][None]
        acts = jnp.tanh(xt + ct) * jax.nn.sigmoid(xs + cs)
        res = jnp.einsum('bto,oh->bth', acts, params["rs_res_w"][i]) + params["rs_res_b"][i][None]
        skip = jnp.einsum('bto,oh->bth', acts, params["rs_skip_w"][i]) + params["rs_skip_b"][i][None]
        h = (h + res) * npad
        output = output + skip

    out = output * npad * npad
    m = jnp.einsum('bth,hl->btl', out, params["out_m_w"]) + params["out_m_b"][None]
    logs = jnp.einsum('bth,hl->btl', out, params["out_s_w"]) + params["out_s_b"][None]
    z = m + noise * jnp.exp(logs)
    return z, m, logs


# ----------------------------------------------------------------------------
if __name__ == "__main__":
    B, c_in, T = 2, 8, 64
    hidden, c_latent, kernel_size, n_layers, c_cond = 32, 8, 3, 2, 16
    stride = 4                       # strides=[4]
    Tout = T // stride

    key = jax.random.PRNGKey(0)
    kx, kc, kn, kp = jax.random.split(key, 4)
    x = jax.random.normal(kx, (B, c_in, T), jnp.float32)
    # nonpadding mask (B, 1, T): second sample has trailing padding
    tlens = jnp.array([T, T - 24])
    tidx = jnp.arange(T)[None, None, :]
    nonpadding = (tidx < tlens[:, None, None]).astype(jnp.float32)
    cond = jax.random.normal(kc, (B, c_cond, Tout), jnp.float32)
    # TODO(synk): torch.randn_like is replaced by deterministic host-generated noise
    noise = jax.random.normal(kn, (B, Tout, c_latent), jnp.float32)

    params = init_params(kp, c_in, hidden, c_latent, kernel_size, n_layers, c_cond, stride)

    z, m, logs, npad_out = fvae_encoder_forward(
        x, nonpadding, cond, noise, params,
        stride=stride, kernel_size=kernel_size, n_layers=n_layers)
    jax.block_until_ready((z, m, logs, npad_out))

    z_r, m_r, logs_r = ref_forward(
        x, nonpadding, cond, noise, params,
        stride=stride, kernel_size=kernel_size, n_layers=n_layers)

    # bf16 matmul operands in the kernel vs f32 reference -> moderate tolerance
    for a, b in ((z, z_r), (m, m_r), (logs, logs_r)):
        err = float(jnp.max(jnp.abs(a - b)))
        assert jnp.allclose(a, b, rtol=5e-2, atol=5e-2), f"max abs err {err}"

    print("KERNEL_OK")
</pallas_src>

<mosaic_0001>
module attributes {stable_mosaic.version = 11 : i64} {
  func.func @_fvae_encoder_kernel(%arg0: i32, %arg1: memref<1x16x128xbf16, #tpu.memory_space<vmem>>, %arg2: memref<1x16x1xf32, #tpu.memory_space<vmem>>, %arg3: memref<1x16x128xbf16, #tpu.memory_space<vmem>>, %arg4: memref<1x16x128xf32, #tpu.memory_space<vmem>>, %arg5: memref<128x128xbf16, #tpu.memory_space<vmem>>, %arg6: memref<1x128xf32, #tpu.memory_space<vmem>>, %arg7: memref<2x384x256xbf16, #tpu.memory_space<vmem>>, %arg8: memref<2x1x256xf32, #tpu.memory_space<vmem>>, %arg9: memref<2x128x256xbf16, #tpu.memory_space<vmem>>, %arg10: memref<2x128x256xbf16, #tpu.memory_space<vmem>>, %arg11: memref<2x1x256xf32, #tpu.memory_space<vmem>>, %arg12: memref<128x256xbf16, #tpu.memory_space<vmem>>, %arg13: memref<1x256xf32, #tpu.memory_space<vmem>>, %arg14: memref<1x16x384xf32, #tpu.memory_space<vmem>>, %arg15: memref<18x128xbf16, #tpu.memory_space<vmem>>) attributes {dimension_semantics = [#tpu.dimension_semantics<parallel>], iteration_bounds = array<i64: 2>, scalar_prefetch = 0 : i64, scratch_operands = 1 : i64, tpu.core_type = #tpu.core_type<tc>, window_params = [{transform_indices = @transform_0, window_bounds = array<i64: 1, 16, 128>}, {transform_indices = @transform_1, window_bounds = array<i64: 1, 16, 1>}, {transform_indices = @transform_2, window_bounds = array<i64: 1, 16, 128>}, {transform_indices = @transform_3, window_bounds = array<i64: 1, 16, 128>}, {pipeline_mode = #tpu.pipeline_mode<synchronous>, transform_indices = @transform_4, window_bounds = array<i64: 128, 128>}, {pipeline_mode = #tpu.pipeline_mode<synchronous>, transform_indices = @transform_5, window_bounds = array<i64: 1, 128>}, {pipeline_mode = #tpu.pipeline_mode<synchronous>, transform_indices = @transform_6, window_bounds = array<i64: 2, 384, 256>}, {pipeline_mode = #tpu.pipeline_mode<synchronous>, transform_indices = @transform_7, window_bounds = array<i64: 2, 1, 256>}, {pipeline_mode = #tpu.pipeline_mode<synchronous>, transform_indices = @transform_8, window_bounds = array<i64: 2, 128, 256>}, {pipeline_mode = #tpu.pipeline_mode<synchronous>, transform_indices = @transform_9, window_bounds = array<i64: 2, 128, 256>}, {pipeline_mode = #tpu.pipeline_mode<synchronous>, transform_indices = @transform_10, window_bounds = array<i64: 2, 1, 256>}, {pipeline_mode = #tpu.pipeline_mode<synchronous>, transform_indices = @transform_11, window_bounds = array<i64: 128, 256>}, {pipeline_mode = #tpu.pipeline_mode<synchronous>, transform_indices = @transform_12, window_bounds = array<i64: 1, 256>}, {transform_indices = @transform_13, window_bounds = array<i64: 1, 16, 384>}]} {
    %c0 = arith.constant 0 : index
    %c0_0 = arith.constant 0 : index
    %c0_1 = arith.constant 0 : index
    %0 = vector.load %arg2[%c0, %c0_0, %c0_1] : memref<1x16x1xf32, #tpu.memory_space<vmem>>, vector<1x16x1xf32>
    %1 = vector.shape_cast %0 : vector<1x16x1xf32> to vector<16x1xf32>
    %2 = vector.shape_cast %1 : vector<16x1xf32> to vector<16x1xf32>
    %3 = vector.broadcast %2 : vector<16x1xf32> to vector<16x128xf32>
    %c0_2 = arith.constant 0 : index
    %c0_3 = arith.constant 0 : index
    %c0_4 = arith.constant 0 : index
    %4 = vector.load %arg1[%c0_2, %c0_3, %c0_4] : memref<1x16x128xbf16, #tpu.memory_space<vmem>>, vector<1x16x128xbf16>
    %5 = vector.shape_cast %4 : vector<1x16x128xbf16> to vector<16x128xbf16>
    %c0_5 = arith.constant 0 : index
    %c0_6 = arith.constant 0 : index
    %6 = vector.load %arg5[%c0_5, %c0_6] : memref<128x128xbf16, #tpu.memory_space<vmem>>, vector<128x128xbf16>
    %cst = arith.constant dense<0.000000e+00> : vector<16x128xf32>
    %7 = tpu.matmul %5, %6, %cst {dimension_numbers = #tpu.dot_dimension_numbers<[1], [0], [0], [1], [0, 0, 1, 1], [], []>} : vector<16x128xbf16>, vector<128x128xbf16>, vector<16x128xf32> -> vector<16x128xf32>
    %c0_7 = arith.constant 0 : index
    %c0_8 = arith.constant 0 : index
    %8 = vector.load %arg6[%c0_7, %c0_8] : memref<1x128xf32, #tpu.memory_space<vmem>>, vector<1x128xf32>
    %9 = vector.broadcast %8 : vector<1x128xf32> to vector<16x128xf32>
    %10 = arith.addf %7, %9 : vector<16x128xf32>
    %11 = arith.mulf %10, %3 : vector<16x128xf32>
    %c0_9 = arith.constant 0 : index
    %c0_10 = arith.constant 0 : index
    %c0_11 = arith.constant 0 : index
    %12 = vector.load %arg3[%c0_9, %c0_10, %c0_11] : memref<1x16x128xbf16, #tpu.memory_space<vmem>>, vector<1x16x128xbf16>
    %13 = vector.shape_cast %12 : vector<1x16x128xbf16> to vector<16x128xbf16>
    %cst_12 = arith.constant 0.000000e+00 : bf16
    %14 = vector.broadcast %cst_12 : bf16 to vector<18x128xbf16>
    %c0_13 = arith.constant 0 : index
    %c0_14 = arith.constant 0 : index
    %15 = vector.load %arg15[%c0_13, %c0_14] : memref<18x128xbf16, #tpu.memory_space<vmem>>, vector<18x128xbf16>
    tpu.vector_store %arg15[%c0_13, %c0_14], %14 {strides = array<i32>} : memref<18x128xbf16, #tpu.memory_space<vmem>>, vector<18x128xbf16>,
    %cst_15 = arith.constant 0.000000e+00 : f32
    %16 = vector.broadcast %cst_15 : f32 to vector<16x128xf32>
    %17 = arith.truncf %11 : vector<16x128xf32> to vector<16x128xbf16>
    %c1 = arith.constant 1 : index
    %c0_16 = arith.constant 0 : index
    %18 = vector.load %arg15[%c1, %c0_16] : memref<18x128xbf16, #tpu.memory_space<vmem>>, vector<16x128xbf16>
    tpu.vector_store %arg15[%c1, %c0_16], %17 {strides = array<i32>} : memref<18x128xbf16, #tpu.memory_space<vmem>>, vector<16x128xbf16>,
    %c0_17 = arith.constant 0 : index
    %c0_18 = arith.constant 0 : index
    %19 = vector.load %arg15[%c0_17, %c0_18] : memref<18x128xbf16, #tpu.memory_space<vmem>>, vector<16x128xbf16>
    %c1_19 = arith.constant 1 : index
    %c0_20 = arith.constant 0 : index
    %20 = vector.load %arg15[%c1_19, %c0_20] : memref<18x128xbf16, #tpu.memory_space<vmem>>, vector<16x128xbf16>
    %c2 = arith.constant 2 : index
    %c0_21 = arith.constant 0 : index
    %21 = vector.load %arg15[%c2, %c0_21] : memref<18x128xbf16, #tpu.memory_space<vmem>>, vector<16x128xbf16>
    %22 = tpu.concatenate %19, %20, %21 in 1 : vector<16x128xbf16>, vector<16x128xbf16>, vector<16x128xbf16> -> vector<16x384xbf16>
    %c0_22 = arith.constant 0 : index
    %c0_23 = arith.constant 0 : index
    %c0_24 = arith.constant 0 : index
    %23 = vector.load %arg7[%c0_22, %c0_23, %c0_24] : memref<2x384x256xbf16, #tpu.memory_space<vmem>>, vector<1x384x256xbf16>
    %24 = vector.shape_cast %23 : vector<1x384x256xbf16> to vector<384x256xbf16>
    %cst_25 = arith.constant dense<0.000000e+00> : vector<16x256xf32>
    %25 = tpu.matmul %22, %24, %cst_25 {dimension_numbers = #tpu.dot_dimension_numbers<[1], [0], [0], [1], [0, 0, 1, 1], [], []>} : vector<16x384xbf16>, vector<384x256xbf16>, vector<16x256xf32> -> vector<16x256xf32>
    %c0_26 = arith.constant 0 : index
    %c0_27 = arith.constant 0 : index
    %c0_28 = arith.constant 0 : index
    %26 = vector.load %arg9[%c0_26, %c0_27, %c0_28] : memref<2x128x256xbf16, #tpu.memory_space<vmem>>, vector<1x128x256xbf16>
    %27 = vector.shape_cast %26 : vector<1x128x256xbf16> to vector<128x256xbf16>
    %cst_29 = arith.constant dense<0.000000e+00> : vector<16x256xf32>
    %28 = tpu.matmul %13, %27, %cst_29 {dimension_numbers = #tpu.dot_dimension_numbers<[1], [0], [0], [1], [0, 0, 1, 1], [], []>} : vector<16x128xbf16>, vector<128x256xbf16>, vector<16x256xf32> -> vector<16x256xf32>
    %29 = arith.addf %25, %28 : vector<16x256xf32>
    %c0_30 = arith.constant 0 : index
    %c0_31 = arith.constant 0 : index
    %c0_32 = arith.constant 0 : index
    %30 = vector.load %arg8[%c0_30, %c0_31, %c0_32] : memref<2x1x256xf32, #tpu.memory_space<vmem>>, vector<1x1x256xf32>
    %31 = vector.shape_cast %30 : vector<1x1x256xf32> to vector<1x256xf32>
    %32 = vector.broadcast %31 : vector<1x256xf32> to vector<16x256xf32>
    %33 = arith.addf %29, %32 : vector<16x256xf32>
    %34 = vector.extract_strided_slice %33 {offsets = [0, 0], sizes = [16, 128], strides = [1, 1]} : vector<16x256xf32> to vector<16x128xf32>
    %35 = math.tanh %34 : vector<16x128xf32>
    %36 = vector.extract_strided_slice %33 {offsets = [0, 128], sizes = [16, 128], strides = [1, 1]} : vector<16x256xf32> to vector<16x128xf32>
    %37 = arith.negf %36 : vector<16x128xf32>
    %38 = math.exp %37 : vector<16x128xf32>
    %cst_33 = arith.constant 1.000000e+00 : f32
    %39 = vector.broadcast %cst_33 : f32 to vector<16x128xf32>
    %40 = arith.addf %39, %38 : vector<16x128xf32>
    %41 = arith.divf %39, %40 : vector<16x128xf32>
    %42 = arith.mulf %35, %41 : vector<16x128xf32>
    %43 = arith.truncf %42 : vector<16x128xf32> to vector<16x128xbf16>
    %c0_34 = arith.constant 0 : index
    %c0_35 = arith.constant 0 : index
    %c0_36 = arith.constant 0 : index
    %44 = vector.load %arg10[%c0_34, %c0_35, %c0_36] : memref<2x128x256xbf16, #tpu.memory_space<vmem>>, vector<1x128x256xbf16>
    %45 = vector.shape_cast %44 : vector<1x128x256xbf16> to vector<128x256xbf16>
    %cst_37 = arith.constant dense<0.000000e+00> : vector<16x256xf32>
    %46 = tpu.matmul %43, %45, %cst_37 {dimension_numbers = #tpu.dot_dimension_numbers<[1], [0], [0], [1], [0, 0, 1, 1], [], []>} : vector<16x128xbf16>, vector<128x256xbf16>, vector<16x256xf32> -> vector<16x256xf32>
    %c0_38 = arith.constant 0 : index
    %c0_39 = arith.constant 0 : index
    %c0_40 = arith.constant 0 : index
    %47 = vector.load %arg11[%c0_38, %c0_39, %c0_40] : memref<2x1x256xf32, #tpu.memory_space<vmem>>, vector<1x1x256xf32>
    %48 = vector.shape_cast %47 : vector<1x1x256xf32> to vector<1x256xf32>
    %49 = vector.broadcast %48 : vector<1x256xf32> to vector<16x256xf32>
    %50 = arith.addf %46, %49 : vector<16x256xf32>
    %51 = vector.extract_strided_slice %50 {offsets = [0, 0], sizes = [16, 128], strides = [1, 1]} : vector<16x256xf32> to vector<16x128xf32>
    %52 = arith.addf %11, %51 : vector<16x128xf32>
    %53 = arith.mulf %52, %3 : vector<16x128xf32>
    %54 = vector.extract_strided_slice %50 {offsets = [0, 128], sizes = [16, 128], strides = [1, 1]} : vector<16x256xf32> to vector<16x128xf32>
    %55 = arith.addf %16, %54 : vector<16x128xf32>
    %56 = arith.truncf %53 : vector<16x128xf32> to vector<16x128xbf16>
    %c1_41 = arith.constant 1 : index
    %c0_42 = arith.constant 0 : index
    %57 = vector.load %arg15[%c1_41, %c0_42] : memref<18x128xbf16, #tpu.memory_space<vmem>>, vector<16x128xbf16>
    tpu.vector_store %arg15[%c1_41, %c0_42], %56 {strides = array<i32>} : memref<18x128xbf16, #tpu.memory_space<vmem>>, vector<16x128xbf16>,
    %c0_43 = arith.constant 0 : index
    %c0_44 = arith.constant 0 : index
    %58 = vector.load %arg15[%c0_43, %c0_44] : memref<18x128xbf16, #tpu.memory_space<vmem>>, vector<16x128xbf16>
    %c1_45 = arith.constant 1 : index
    %c0_46 = arith.constant 0 : index
    %59 = vector.load %arg15[%c1_45, %c0_46] : memref<18x128xbf16, #tpu.memory_space<vmem>>, vector<16x128xbf16>
    %c2_47 = arith.constant 2 : index
    %c0_48 = arith.constant 0 : index
    %60 = vector.load %arg15[%c2_47, %c0_48] : memref<18x128xbf16, #tpu.memory_space<vmem>>, vector<16x128xbf16>
    %61 = tpu.concatenate %58, %59, %60 in 1 : vector<16x128xbf16>, vector<16x128xbf16>, vector<16x128xbf16> -> vector<16x384xbf16>
    %c1_49 = arith.constant 1 : index
    %c0_50 = arith.constant 0 : index
    %c0_51 = arith.constant 0 : index
    %62 = vector.load %arg7[%c1_49, %c0_50, %c0_51] : memref<2x384x256xbf16, #tpu.memory_space<vmem>>, vector<1x384x256xbf16>
    %63 = vector.shape_cast %62 : vector<1x384x256xbf16> to vector<384x256xbf16>
    %cst_52 = arith.constant dense<0.000000e+00> : vector<16x256xf32>
    %64 = tpu.matmul %61, %63, %cst_52 {dimension_numbers = #tpu.dot_dimension_numbers<[1], [0], [0], [1], [0, 0, 1, 1], [], []>} : vector<16x384xbf16>, vector<384x256xbf16>, vector<16x256xf32> -> vector<16x256xf32>
    %c1_53 = arith.constant 1 : index
    %c0_54 = arith.constant 0 : index
    %c0_55 = arith.constant 0 : index
    %65 = vector.load %arg9[%c1_53, %c0_54, %c0_55] : memref<2x128x256xbf16, #tpu.memory_space<vmem>>, vector<1x128x256xbf16>
    %66 = vector.shape_cast %65 : vector<1x128x256xbf16> to vector<128x256xbf16>
    %cst_56 = arith.constant dense<0.000000e+00> : vector<16x256xf32>
    %67 = tpu.matmul %13, %66, %cst_56 {dimension_numbers = #tpu.dot_dimension_numbers<[1], [0], [0], [1], [0, 0, 1, 1], [], []>} : vector<16x128xbf16>, vector<128x256xbf16>, vector<16x256xf32> -> vector<16x256xf32>
    %68 = arith.addf %64, %67 : vector<16x256xf32>
    %c1_57 = arith.constant 1 : index
    %c0_58 = arith.constant 0 : index
    %c0_59 = arith.constant 0 : index
    %69 = vector.load %arg8[%c1_57, %c0_58, %c0_59] : memref<2x1x256xf32, #tpu.memory_space<vmem>>, vector<1x1x256xf32>
    %70 = vector.shape_cast %69 : vector<1x1x256xf32> to vector<1x256xf32>
    %71 = vector.broadcast %70 : vector<1x256xf32> to vector<16x256xf32>
    %72 = arith.addf %68, %71 : vector<16x256xf32>
    %73 = vector.extract_strided_slice %72 {offsets = [0, 0], sizes = [16, 128], strides = [1, 1]} : vector<16x256xf32> to vector<16x128xf32>
    %74 = math.tanh %73 : vector<16x128xf32>
    %75 = vector.extract_strided_slice %72 {offsets = [0, 128], sizes = [16, 128], strides = [1, 1]} : vector<16x256xf32> to vector<16x128xf32>
    %76 = arith.negf %75 : vector<16x128xf32>
    %77 = math.exp %76 : vector<16x128xf32>
    %cst_60 = arith.constant 1.000000e+00 : f32
    %78 = vector.broadcast %cst_60 : f32 to vector<16x128xf32>
    %79 = arith.addf %78, %77 : vector<16x128xf32>
    %80 = arith.divf %78, %79 : vector<16x128xf32>
    %81 = arith.mulf %74, %80 : vector<16x128xf32>
    %82 = arith.truncf %81 : vector<16x128xf32> to vector<16x128xbf16>
    %c1_61 = arith.constant 1 : index
    %c0_62 = arith.constant 0 : index
    %c0_63 = arith.constant 0 : index
    %83 = vector.load %arg10[%c1_61, %c0_62, %c0_63] : memref<2x128x256xbf16, #tpu.memory_space<vmem>>, vector<1x128x256xbf16>
    %84 = vector.shape_cast %83 : vector<1x128x256xbf16> to vector<128x256xbf16>
    %cst_64 = arith.constant dense<0.000000e+00> : vector<16x256xf32>
    %85 = tpu.matmul %82, %84, %cst_64 {dimension_numbers = #tpu.dot_dimension_numbers<[1], [0], [0], [1], [0, 0, 1, 1], [], []>} : vector<16x128xbf16>, vector<128x256xbf16>, vector<16x256xf32> -> vector<16x256xf32>
    %c1_65 = arith.constant 1 : index
    %c0_66 = arith.constant 0 : index
    %c0_67 = arith.constant 0 : index
    %86 = vector.load %arg11[%c1_65, %c0_66, %c0_67] : memref<2x1x256xf32, #tpu.memory_space<vmem>>, vector<1x1x256xf32>
    %87 = vector.shape_cast %86 : vector<1x1x256xf32> to vector<1x256xf32>
    %88 = vector.broadcast %87 : vector<1x256xf32> to vector<16x256xf32>
    %89 = arith.addf %85, %88 : vector<16x256xf32>
    %90 = vector.extract_strided_slice %89 {offsets = [0, 128], sizes = [16, 128], strides = [1, 1]} : vector<16x256xf32> to vector<16x128xf32>
    %91 = arith.addf %55, %90 : vector<16x128xf32>
    %92 = arith.mulf %91, %3 : vector<16x128xf32>
    %93 = arith.truncf %92 : vector<16x128xf32> to vector<16x128xbf16>
    %c0_68 = arith.constant 0 : index
    %c0_69 = arith.constant 0 : index
    %94 = vector.load %arg12[%c0_68, %c0_69] : memref<128x256xbf16, #tpu.memory_space<vmem>>, vector<128x256xbf16>
    %cst_70 = arith.constant dense<0.000000e+00> : vector<16x256xf32>
    %95 = tpu.matmul %93, %94, %cst_70 {dimension_numbers = #tpu.dot_dimension_numbers<[1], [0], [0], [1], [0, 0, 1, 1], [], []>} : vector<16x128xbf16>, vector<128x256xbf16>, vector<16x256xf32> -> vector<16x256xf32>
    %c0_71 = arith.constant 0 : index
    %c0_72 = arith.constant 0 : index
    %96 = vector.load %arg13[%c0_71, %c0_72] : memref<1x256xf32, #tpu.memory_space<vmem>>, vector<1x256xf32>
    %97 = vector.broadcast %96 : vector<1x256xf32> to vector<16x256xf32>
    %98 = arith.addf %95, %97 : vector<16x256xf32>
    %99 = vector.extract_strided_slice %98 {offsets = [0, 0], sizes = [16, 128], strides = [1, 1]} : vector<16x256xf32> to vector<16x128xf32>
    %100 = vector.extract_strided_slice %98 {offsets = [0, 128], sizes = [16, 128], strides = [1, 1]} : vector<16x256xf32> to vector<16x128xf32>
    %c0_73 = arith.constant 0 : index
    %c0_74 = arith.constant 0 : index
    %c0_75 = arith.constant 0 : index
    %101 = vector.load %arg4[%c0_73, %c0_74, %c0_75] : memref<1x16x128xf32, #tpu.memory_space<vmem>>, vector<1x16x128xf32>
    %102 = vector.shape_cast %101 : vector<1x16x128xf32> to vector<16x128xf32>
    %103 = math.exp %100 : vector<16x128xf32>
    %104 = arith.mulf %102, %103 : vector<16x128xf32>
    %105 = arith.addf %99, %104 : vector<16x128xf32>
    %106 = tpu.concatenate %105, %99, %100 in 1 : vector<16x128xf32>, vector<16x128xf32>, vector<16x128xf32> -> vector<16x384xf32>
    %c0_76 = arith.constant 0 : index
    %c0_77 = arith.constant 0 : index
    %c0_78 = arith.constant 0 : index
    %107 = vector.load %arg14[%c0_76, %c0_77, %c0_78] : memref<1x16x384xf32, #tpu.memory_space<vmem>>, vector<1x16x384xf32>
    %108 = vector.shape_cast %107 : vector<1x16x384xf32> to vector<16x384xf32>
    %109 = vector.shape_cast %106 : vector<16x384xf32> to vector<1x16x384xf32>
    tpu.vector_store %arg14[%c0_76, %c0_77, %c0_78], %109 {strides = array<i32>} : memref<1x16x384xf32, #tpu.memory_space<vmem>>, vector<1x16x384xf32>,
    return
  }
  func.func @transform_0(%arg0: i32) -> (i32, i32, i32) {
    %c0_i32 = arith.constant 0 : i32
    %c0_i32_0 = arith.constant 0 : i32
    %c0_i32_1 = arith.constant 0 : i32
    return %arg0, %c0_i32, %c0_i32_0 : i32, i32, i32
  }
  func.func @transform_1(%arg0: i32) -> (i32, i32, i32) {
    %c0_i32 = arith.constant 0 : i32
    %c0_i32_0 = arith.constant 0 : i32
    %c0_i32_1 = arith.constant 0 : i32
    return %arg0, %c0_i32, %c0_i32_0 : i32, i32, i32
  }
  func.func @transform_2(%arg0: i32) -> (i32, i32, i32) {
    %c0_i32 = arith.constant 0 : i32
    %c0_i32_0 = arith.constant 0 : i32
    %c0_i32_1 = arith.constant 0 : i32
    return %arg0, %c0_i32, %c0_i32_0 : i32, i32, i32
  }
  func.func @transform_3(%arg0: i32) -> (i32, i32, i32) {
    %c0_i32 = arith.constant 0 : i32
    %c0_i32_0 = arith.constant 0 : i32
    %c0_i32_1 = arith.constant 0 : i32
    return %arg0, %c0_i32, %c0_i32_0 : i32, i32, i32
  }
  func.func @transform_4(%arg0: i32) -> (i32, i32) {
    %c0_i32 = arith.constant 0 : i32
    %c0_i32_0 = arith.constant 0 : i32
    %c0_i32_1 = arith.constant 0 : i32
    return %c0_i32, %c0_i32_0 : i32, i32
  }
  func.func @transform_5(%arg0: i32) -> (i32, i32) {
    %c0_i32 = arith.constant 0 : i32
    %c0_i32_0 = arith.constant 0 : i32
    %c0_i32_1 = arith.constant 0 : i32
    return %c0_i32, %c0_i32_0 : i32, i32
  }
  func.func @transform_6(%arg0: i32) -> (i32, i32, i32) {
    %c0_i32 = arith.constant 0 : i32
    %c0_i32_0 = arith.constant 0 : i32
    %c0_i32_1 = arith.constant 0 : i32
    %c0_i32_2 = arith.constant 0 : i32
    return %c0_i32, %c0_i32_0, %c0_i32_1 : i32, i32, i32
  }
  func.func @transform_7(%arg0: i32) -> (i32, i32, i32) {
    %c0_i32 = arith.constant 0 : i32
    %c0_i32_0 = arith.constant 0 : i32
    %c0_i32_1 = arith.constant 0 : i32
    %c0_i32_2 = arith.constant 0 : i32
    return %c0_i32, %c0_i32_0, %c0_i32_1 : i32, i32, i32
  }
  func.func @transform_8(%arg0: i32) -> (i32, i32, i32) {
    %c0_i32 = arith.constant 0 : i32
    %c0_i32_0 = arith.constant 0 : i32
    %c0_i32_1 = arith.constant 0 : i32
    %c0_i32_2 = arith.constant 0 : i32
    return %c0_i32, %c0_i32_0, %c0_i32_1 : i32, i32, i32
  }
  func.func @transform_9(%arg0: i32) -> (i32, i32, i32) {
    %c0_i32 = arith.constant 0 : i32
    %c0_i32_0 = arith.constant 0 : i32
    %c0_i32_1 = arith.constant 0 : i32
    %c0_i32_2 = arith.constant 0 : i32
    return %c0_i32, %c0_i32_0, %c0_i32_1 : i32, i32, i32
  }
  func.func @transform_10(%arg0: i32) -> (i32, i32, i32) {
    %c0_i32 = arith.constant 0 : i32
    %c0_i32_0 = arith.constant 0 : i32
    %c0_i32_1 = arith.constant 0 : i32
    %c0_i32_2 = arith.constant 0 : i32
    return %c0_i32, %c0_i32_0, %c0_i32_1 : i32, i32, i32
  }
  func.func @transform_11(%arg0: i32) -> (i32, i32) {
    %c0_i32 = arith.constant 0 : i32
    %c0_i32_0 = arith.constant 0 : i32
    %c0_i32_1 = arith.constant 0 : i32
    return %c0_i32, %c0_i32_0 : i32, i32
  }
  func.func @transform_12(%arg0: i32) -> (i32, i32) {
    %c0_i32 = arith.constant 0 : i32
    %c0_i32_0 = arith.constant 0 : i32
    %c0_i32_1 = arith.constant 0 : i32
    return %c0_i32, %c0_i32_0 : i32, i32
  }
  func.func @transform_13(%arg0: i32) -> (i32, i32, i32) {
    %c0_i32 = arith.constant 0 : i32
    %c0_i32_0 = arith.constant 0 : i32
    %c0_i32_1 = arith.constant 0 : i32
    return %arg0, %c0_i32, %c0_i32_0 : i32, i32, i32
  }
}

</mosaic_0001>

<bundles_post_ra>
// kernel: tpu_custom_call.1
= control target key start
LH: loop header
LB: loop body
LE: loop exit
PB: predicated region body
PF: predicated region fallthrough
CT: control target
= control target key end

     0   :  { %s4450_s0 = inlined_call_operand.hbm [shape: bf16[2,16,128], index: 0, kind: input, shape index: {}]   ;;  %s4451_s1 = inlined_call_operand.vmem [shape: f32[2,16,1], index: 1, kind: input, shape index: {}]   ;;  %s4452_s2 = inlined_call_operand.hbm [shape: bf16[2,16,128], index: 2, kind: input, shape index: {}]   ;;  %s4453_s3 = inlined_call_operand.vmem [shape: f32[2,16,128], index: 3, kind: input, shape index: {}]   ;;  %s4454_s4 = inlined_call_operand.hbm [shape: bf16[128,128], index: 4, kind: input, shape index: {}]   ;;  %s4455_s5 = inlined_call_operand.hbm [shape: f32[1,128], index: 5, kind: input, shape index: {}]   ;;  %s4456_s6 = inlined_call_operand.hbm [shape: bf16[2,384,256], index: 6, kind: input, shape index: {}]   ;;  %s4457_s7 = inlined_call_operand.vmem [shape: f32[2,1,256], index: 7, kind: input, shape index: {}]   ;;  %s4458_s8 = inlined_call_operand.hbm [shape: bf16[2,128,256], index: 8, kind: input, shape index: {}]   ;;  %s4459_s9 = inlined_call_operand.hbm [shape: bf16[2,128,256], index: 9, kind: input, shape index: {}]   ;;  %s4460_s10 = inlined_call_operand.vmem [shape: f32[2,1,256], index: 10, kind: input, shape index: {}]   ;;  %s4461_s11 = inlined_call_operand.hbm [shape: bf16[128,256], index: 11, kind: input, shape index: {}]   ;;  %s4462_s12 = inlined_call_operand.vmem [shape: f32[1,256], index: 12, kind: input, shape index: {}]   ;;  %s4463_s13 = inlined_call_operand.hbm [shape: f32[2,16,384], index: 13, kind: output, shape index: {}]  }
   0x1   :  { %4470 = sst [smem:[#allocation26_spill]] %s4450_s0 }
   0x2   :  { %4471 = sst [smem:[#allocation27_spill]] %s4453_s3 }
   0x3   :  { %4472 = sst [smem:[#allocation28_spill]] %s4454_s4 }
   0x4   :  { %4473 = sst [smem:[#allocation29_spill]] %s4455_s5 }
   0x5   :  { %4474 = sst [smem:[#allocation30_spill]] %s4456_s6 }
   0x6   :  { %4475 = sst [smem:[#allocation31_spill]] %s4458_s8 }
   0x7   :  { %4476 = sst [smem:[#allocation32_spill]] %s4459_s9 }
   0x8   :  { %4477 = sst [smem:[#allocation33_spill]] %s4460_s10 }
   0x9   :  { %4478 = sst [smem:[#allocation34_spill]] %s4461_s11 }
   0xa   :  { %4479 = sst [smem:[#allocation35_spill]] %s4462_s12 }
   0xb   :  { %4480 = sst [smem:[#allocation36_spill]] %s4463_s13 }
   0xc   :  { %18 = vsyncpa [#allocation4], 0 }
   0xd   :  { %20 = vsyncpa [#allocation4 + $0x1], 0 }
   0xe   :  { %21 = vsyncpa [#allocation7], 0 }
   0xf   :  { %23 = vsyncpa [#allocation7 + $0x1], 0 }
  0x10   :  { %24 = vsyncpa [#allocation10], 0 }
  0x11   :  { %25 = vsyncpa [#allocation13], 0 }
  0x12   :  { %26 = vsyncpa [#allocation16], 0 }
  0x13   :  { %27 = vsyncpa [#allocation5], 0 }
  0x14   :  { %29 = vsyncpa [#allocation5 + $0x1], 0  ;;  %s4054_s25 = smov 0   ;;  %s4056_s26 = smov 0  }
  0x15   :  { %s4058_s27 = smov 0   ;;  %s4060_s28 = smov 0  }
  0x16 LB: > { %s4481_s4 = sld [smem:[#allocation28_spill]]  ;;  %s4078_s15 = sadd.s32 4294967295, %s3969_s28   ;;  %s3969_s28 = sphi %s4060_s28, %s4513_s28   ;;  %s3965_s27 = sphi %s4058_s27, %s4512_s27   ;;  %s3961_s26 = sphi %s4056_s26, %s4511_s26   ;;  %s3957_s25 = sphi %s4054_s25, %s4510_s25  }
  0x17   : > { %p2555_p0 = scmp.ge.s32.totalorder %s3969_s28, 1  ;;  %p56_p1 = scmp.eq.s32.totalorder %s4078_s15, 0 }
  0x18   : > { %p359_p2 = scmp.lt.s32.totalorder %s3969_s28, 3  ;;  %s3971_s17 = smov [#allocation8]  }
  0x19   : > { %s372_s18 = sshll.u32 %s3971_s17, 4  ;;  %s4483_s5 = sld [smem:[#allocation29_spill]]  ;;  %s373_s18 = int_to_ptr.vmem [resolvable:$true] %s372_s18 }
  0x1a   : > { %p4083_p3 = pnand %p2555_p0, %p359_p2  ;;  %s3972_s23 = smov [#allocation9]  }
  0x1b   : > { %s387_s24 = sshll.u32 %s3972_s23, 4  ;;  %s4466_s29 = smov 64   ;;  %s388_s24 = int_to_ptr.vmem [resolvable:$true] %s387_s24 }
  0x1c   : > { %s370_s14 = sshll.u32 %s4481_s4, 4  ;;  %p3524_p4 = pneg %p4083_p3  ;;  %s371_s14 = int_to_ptr.hbm [resolvable:$true] %s370_s14 }
  0x1d   : > { %s4468_s30 = smov 4   ;;  %s4485_s8 = sld [smem:[#allocation31_spill]] }
  0x1e   : > { %p4095_p6 = pnand %p3524_p4, %p56_p1  ;;  %s3975_s4 = smov [#allocation12]  }
  0x1f   : > { %s385_s21 = sshll.u32 %s4483_s5, 4  ;;  %s415_s5 = sshll.u32 %s3975_s4, 4  ;;  %s386_s21 = int_to_ptr.hbm [resolvable:$true] %s385_s21  ;;  %s416_s5 = int_to_ptr.vmem [resolvable:$true] %s415_s5 }
  0x20   : > { %3527 = dma.hbm_to_vmem [thread:$0]  (!%p4095_p6), %s371_s14, 1024, %s373_s18, [#allocation7], %s4466_s29, %s4466_s29, %s4468_s30  }
  0x21   : > { %3530 = dma.hbm_to_vmem [thread:$0]  (!%p4095_p6), %s386_s21, 16, %s388_s24, [#allocation10]  }
  0x22   : > { %s4486_s6 = sld [smem:[#allocation30_spill]]  ;;  %s3976_s12 = smov 128  }
  0x23   : > { %s413_s20 = sshll.u32 %s4485_s8, 4  ;;  %s3977_s10 = smov 8   ;;  %s414_s20 = int_to_ptr.hbm [resolvable:$true] %s413_s20 }
  0x24   : > { %3536 = dma.hbm_to_vmem [thread:$0]  (!%p4095_p6), %s414_s20, 4096, %s416_s5, [#allocation13], %s3976_s12, %s3976_s12, %s3977_s10  }
  0x25   : > { %s3978_s14 = smov [#allocation11]   ;;  %s4487_s9 = sld [smem:[#allocation32_spill]] }
  0x26   : > { %s398_s18 = sshll.u32 %s3978_s14, 4  ;;  %s4488_s11 = sld [smem:[#allocation34_spill]]  ;;  %s399_s18 = int_to_ptr.vmem [resolvable:$true] %s398_s18 }
  0x27   : > { %s3979_s19 = smov [#allocation14]   ;;  %s3980_s23 = smov [#allocation15]  }
  0x28   : > { %s396_s3 = sshll.u32 %s4486_s6, 4  ;;  %s429_s20 = sshll.u32 %s3979_s19, 4  ;;  %s397_s3 = int_to_ptr.hbm [resolvable:$true] %s396_s3  ;;  %s430_s20 = int_to_ptr.vmem [resolvable:$true] %s429_s20 }
  0x29   : > { %3533 = dma.hbm_to_vmem [thread:$0]  (!%p4095_p6), %s397_s3, 12288, %s399_s18, [#allocation10], %s3976_s12, %s3976_s12, %s3977_s10  }
  0x2a   : > { %s446_s3 = sshll.u32 %s3980_s23, 4  ;;  %s2554_s14 = sadd.s32 4294967294, %s3969_s28   ;;  %s447_s3 = int_to_ptr.vmem [resolvable:$true] %s446_s3 }
  0x2b   : > { %s427_s4 = sshll.u32 %s4487_s9, 4  ;;  %s4128_s18 = sadd.s32 1, %s3969_s28   ;;  %s428_s4 = int_to_ptr.hbm [resolvable:$true] %s427_s4 }
  0x2c   : > { %s444_s5 = sshll.u32 %s4488_s11, 4  ;;  %s39_s21 = ssub.s32 %s3969_s28, %s4128_s18  ;;  %s445_s5 = int_to_ptr.hbm [resolvable:$true] %s444_s5 }
  0x2d   : > { %3539 = dma.hbm_to_vmem [thread:$0]  (!%p4095_p6), %s428_s4, 4096, %s430_s20, [#allocation13], %s3976_s12, %s3976_s12, %s3977_s10  }
  0x2e   : > { %3542 = dma.hbm_to_vmem [thread:$0]  (!%p4095_p6), %s445_s5, 2048, %s447_s3, [#allocation16], %s3976_s12, %s3976_s12, %s3977_s10  }
  0x2f   : > { %s42_s24 = sadd.s32 1, %s3965_s27  ;;  %p40_p7 = scmp.eq.s32.totalorder %s39_s21, 0 }
  0x30   : > { %p49_p8 = scmp.ne.s32.totalorder %s3965_s27, %s3961_s26  ;;  %p50_p9 = scmp.eq.s32.totalorder %s3969_s28, 0 }
  0x31   : > { %p55_p10 = scmp.ne.s32.totalorder %s3961_s26, %s3957_s25  ;;  %p346_p13 = scmp.eq.s32.totalorder %s4078_s15, 1 }
  0x32   : > { %s4139_s4 = scalar_select %p40_p7, %s3965_s27, %s42_s24  }
  0x33   : > { %p4141_p11 = por %p50_p9, %p49_p8  ;;  %p4147_p12 = por %p56_p1, %p55_p10 }
  0x34   : > { %4489 = sst [smem:[#allocation25_spill]] %s4139_s4  ;;  %p352_p0 = scmp.eq.s32.totalorder %s2554_s14, 1 }
  0x35   : > { %p3560_p2 = scmp.lt.s32.totalorder %s3969_s28, 2  ;;  %s463_s12 = sand.u32 1, %s3965_s27  }
  0x36   : > { %p4154_p4 = por %p346_p13, %p49_p8  ;;  %p4158_p6 = por %p352_p0, %p55_p10 }
  0x37   : > { %s4162_s5 = sshll.u32 %s463_s12, 3  ;;  %s3303_s19 = sshll.u32 %s3969_s28, 3 }
  0x38   : > { %s4494_s0 = sld [smem:[#allocation26_spill]]  ;;  %s467_s21 = scalar_lea.vmem [#allocation3], %s4162_s5 }
  0x39   : > { %s475_s14 = sshll.u32 %s467_s21, 4  ;;  %p4171_p7 = pnand %p3560_p2, %p4141_p11  ;;  %s476_s14 = int_to_ptr.vmem [resolvable:$true] %s475_s14 }
  0x3a   : > { %s502_s8 = scalar_lea.hbm %s4452_s2, %s3303_s19  ;;  %s464_s11 = scalar_lea.sflag [#allocation4], %s463_s12 }
  0x3b   : > { %s503_s9 = sshll.u32 %s502_s8, 4  ;;  %p3827_p9 = pneg %p4171_p7  ;;  %s504_s9 = int_to_ptr.hbm [resolvable:$true] %s503_s9 }
  0x3e   : > { %s472_s3 = scalar_lea.hbm %s4494_s0, %s3303_s19  ;;  %s3830_s21 = scalar_lea.hbm %s4494_s0, 16 }
  0x3f   : > { %s473_s24 = sshll.u32 %s472_s3, 4  ;;  %s474_s24 = int_to_ptr.hbm [resolvable:$true] %s473_s24 }
  0x40   : > { %s3823_s20 = sshra.s32 %s474_s24, 4  ;;  %s3824_s20 = int_to_ptr.hbm [resolvable:$true] %s3823_s20 }
  0x41   : > { %s3825_s23 = scalar_lea.hbm %s3824_s20, 8  ;;  %p3831_p13 = scmp.lt.s32.totalorder %s3824_s20, %s4494_s0 }
  0x42   : > { %p3826_p8 = scmp.ne.s32.totalorder %s3824_s20, %s3825_s23  ;;  %p3832_p0 = scmp.lt.s32.totalorder %s3830_s21, %s3825_s23 }
  0x44   : > { %p3828_p10 = pnand %p3827_p9, %p3826_p8  ;;  %p3833_p2 = por %p3832_p0, %p3831_p13 }
  0x46   : > { %p3829_p11 = pneg %p3828_p10 }
  0x48   : > { %p3834_p5 = pnand %p3833_p2, %p3829_p11 }
  0x4a   : > { %3837 = shalt.err (!%p3834_p5)
}
  0x4b   : > { %s4496_s8 = smov 4   ;;  %s4497_s12 = smov 64  }
  0x4c   : > { %3546 = dma.hbm_to_vmem [thread:$0]  (!%p4171_p7), %s474_s24, 128, %s476_s14, %s464_s11, %s4497_s12, %s4497_s12, %s4496_s8  }
  0x4d   : > { %s497_s19 = scalar_lea.vmem [#allocation6], %s4162_s5  ;;  %s493_s3 = sand.u32 1, %s3969_s28  }
  0x4e   : > { %s505_s13 = sshll.u32 %s497_s19, 4  ;;  %s494_s6 = scalar_lea.sflag [#allocation7], %s493_s3  ;;  %s506_s13 = int_to_ptr.vmem [resolvable:$true] %s505_s13 }
  0x4f   : > { %s3853_s20 = sshra.s32 %s504_s9, 4  ;;  %s3860_s0 = scalar_lea.hbm %s4452_s2, 16  ;;  %s3854_s20 = int_to_ptr.hbm [resolvable:$true] %s3853_s20 }
  0x50   : > { %s3855_s23 = scalar_lea.hbm %s3854_s20, 8  ;;  %p3861_p11 = scmp.lt.s32.totalorder %s3854_s20, %s4452_s2 }
  0x51   : > { %p3856_p8 = scmp.ne.s32.totalorder %s3854_s20, %s3855_s23  ;;  %p3862_p13 = scmp.lt.s32.totalorder %s3860_s0, %s3855_s23 }
  0x53   : > { %p3858_p5 = pnand %p3856_p8, %p3827_p9  ;;  %p3863_p0 = por %p3862_p13, %p3861_p11 }
  0x55   : > { %p3859_p10 = pneg %p3858_p5 }
  0x57   : > { %p3864_p2 = pnand %p3863_p0, %p3859_p10 }
  0x59   : > { %3867 = shalt.err (!%p3864_p2)
}
  0x5a   : > { %3549 = dma.hbm_to_vmem [thread:$0]  (!%p4171_p7), %s504_s9, 128, %s506_s13, %s494_s6, %s4497_s12, %s4497_s12, %s4496_s8  }
  0x5b   : > { %525 = sbr.rel (%p4083_p3) target bundleno = 1153 (0x481), region = 72  ;;  %s4213_s5 = sand.u32 (!%p4083_p3), 1, %s3961_s26  }
  0x5c   : > { %s2570_s4 = sshll.u32 (!%p4083_p3), %s4213_s5, 3  ;;  %s528_s0 = scalar_lea.sflag (!%p4083_p3), [#allocation4], %s4213_s5 }
  0x5d   : > { %s4217_s14 = scalar_lea.vmem (!%p4083_p3), [#allocation3], %s2570_s4 }
  0x60   : > { %3928 = dma.done.wait (%p4147_p12), %s528_s0, 128  }
  0x61   : > { %3930 = vsyncadd (%p4147_p12), %s528_s0, 4294967168  ;;  %s537_s9 = sand.u32 1, %s4078_s15   ;;  %s4224_s29 = scalar_lea.vmem [#allocation6], %s2570_s4 }
  0x62   : > { %s538_s16 = scalar_lea.sflag [#allocation7], %s537_s9 }
  0x63   : > { %3932 = dma.done.wait (%p4147_p12), %s538_s16, 128  }
  0x64   : > { %3934 = vsyncadd (%p4147_p12), %s538_s16, 4294967168 }
  0x65   : > { %3936 = dma.done.wait (%p56_p1), [#allocation7], 1024  }
  0x66   : > { %3938 = vsyncadd (%p56_p1), [#allocation7], 4294966272 }
  0x67   : > { %3940 = dma.done.wait (%p56_p1), [#allocation10], 12304  }
  0x68   : > { %3942 = vsyncadd (%p56_p1), [#allocation10], 4294954992 }
  0x69   : > { %3944 = dma.done.wait (%p56_p1), [#allocation13], 8192  }
  0x6a   : > { %3946 = vsyncadd (%p56_p1), [#allocation13], 4294959104 }
  0x6b   : > { %3948 = dma.done.wait (%p56_p1), [#allocation16], 2048  }
  0x6c   : > { %3950 = vsyncadd (%p56_p1), [#allocation16], 4294965248  ;;  %p630_p3 = scmp.lt.s32.totalorder %s4078_s15, 1  ;;  %v3315_v0 = vld [vmem:[#allocation8 + $0x38] sm:$0xff]  ;;  %v3314_v1 = vld [vmem:[#allocation8 + $0x30] sm:$0xff]  ;;  %v3981_v2 = vmov 0  }
  0x6d   : > { %729 = vmatpush.bf16.msra.mxu0 %v3315_v0  ;;  %3613 = vset.pattern.permute.xlu0 %v3981_v2  ;;  %747 = vst [vmem:[#allocation2] sm:$0xf] %v3981_v2  ;;  %v3313_v4 = vld [vmem:[#allocation8 + $0x28] sm:$0xff]  ;;  %v3379_v5 = vld [vmem:[#allocation12 + $0x74] sm:$0xf]  ;;  %v3312_v15 = vld [vmem:[#allocation8 + $0x20] sm:$0xff] }
  0x6e   : > { %s4248_s10 = scalar_select %p630_p3, %s4078_s15, 1  ;;  %748 = vst [vmem:[#allocation2 + $0x4] sm:$0xf] %v3981_v2  ;;  %v2682_v6 = vld [vmem:[#allocation12 + $0x78] sm:$0xf0]  ;;  %v3310_v40 = vld [vmem:[#allocation8 + $0x10] sm:$0xff] }
  0x6f   : > { %749 = vst [vmem:[#allocation2 + $0x8] sm:$0x1] %v3981_v2  ;;  %v2680_v7 = vld [vmem:[#allocation12 + $0x70] sm:$0xf]  ;;  %v3380_v8 = vld [vmem:[#allocation12 + $0x74] sm:$0xf0]  ;;  %v2685_v9 = vor.u32 %v3379_v5, %v2682_v6 }
  0x70   : > { %s3305_s24 = sshll.u32 %s4248_s10, 4  ;;  %v2681_v10 = vor.u32 %v3380_v8, %v2680_v7  ;;  %v3377_v11 = vld [vmem:[#allocation12 + $0x64] sm:$0xf]  ;;  %v2674_v12 = vld [vmem:[#allocation12 + $0x68] sm:$0xf0]  ;;  %v3311_v32 = vld [vmem:[#allocation8 + $0x18] sm:$0xff] }
  0x71   : > { %s634_s19 = scalar_lea.vmem %s4451_s1, %s3305_s24  ;;  %730 = vmatpush.bf16.msra.mxu0 %v3314_v1  ;;  %v2672_v13 = vld [vmem:[#allocation12 + $0x60] sm:$0xf]  ;;  %v3378_v14 = vld [vmem:[#allocation12 + $0x64] sm:$0xf0]  ;;  %986 = vmatpush.bf16.msra.mxu2 %v2685_v9  ;;  %v2677_v16 = vor.u32 %v3377_v11, %v2674_v12  ;;  %v3375_v19 = vld [vmem:[#allocation12 + $0x54] sm:$0xf] }
  0x72   : > { %v641_v3 = vld [vmem:[%s634_s19] sm:$0xff]  ;;  %972 = vmatpush.bf16.msra.mxu1 %v2681_v10  ;;  %v642_v17 = vld [vmem:[%s634_s19 + $0x8] sm:$0xff]  ;;  %v2673_v18 = vor.u32 %v3378_v14, %v2672_v13  ;;  %v3373_v26 = vld [vmem:[#allocation12 + $0x44] sm:$0xf]  ;;  %vm775_vm0 = vcmask 1043456   ;;  %vm782_vm5 = vcmask 1040384  }
  0x73   : > { %645 = vperm.xlu0 %3613, %v641_v3   ;;  %v2666_v20 = vld [vmem:[#allocation12 + $0x58] sm:$0xf0]  ;;  %v2664_v21 = vld [vmem:[#allocation12 + $0x50] sm:$0xf]  ;;  %v3376_v22 = vld [vmem:[#allocation12 + $0x54] sm:$0xf0] }
  0x74   : > { %v2744_v23 = vld [vmem:[#allocation11 + $0x70] sm:$0xf]  ;;  %v3332_v24 = vld [vmem:[#allocation11 + $0x74] sm:$0xf0]  ;;  %v2669_v25 = vor.u32 %v3375_v19, %v2666_v20  ;;  %v2736_v28 = vld [vmem:[#allocation11 + $0x60] sm:$0xf]  ;;  %v2665_v29 = vor.u32 %v3376_v22, %v2664_v21 }
  0x75   : > { %731 = vmatpush.bf16.msra.mxu0 %v3313_v4  ;;  %987 = vmatpush.bf16.msra.mxu2 %v2677_v16  ;;  %v2745_v27 = vor.u32 %v3332_v24, %v2744_v23  ;;  %v2658_v30 = vld [vmem:[#allocation12 + $0x48] sm:$0xf0]  ;;  %v3330_v31 = vld [vmem:[#allocation11 + $0x64] sm:$0xf0]  ;;  %v2656_v33 = vld [vmem:[#allocation12 + $0x40] sm:$0xf] }
  0x76   : > { %973 = vmatpush.bf16.msra.mxu1 %v2673_v18  ;;  %v3374_v34 = vld [vmem:[#allocation12 + $0x44] sm:$0xf0]  ;;  %v2737_v35 = vor.u32 %v3330_v31, %v2736_v28  ;;  %v2661_v36 = vor.u32 %v3373_v26, %v2658_v30  ;;  %v3371_v38 = vld [vmem:[#allocation12 + $0x34] sm:$0xf]  ;;  %v2650_v39 = vld [vmem:[#allocation12 + $0x38] sm:$0xf0] }
  0x77   : > { %1240 = vmatpush.bf16.msra.mxu3 %v2745_v27  ;;  %v2657_v37 = vor.u32 %v3374_v34, %v2656_v33  ;;  %v2648_v41 = vld [vmem:[#allocation12 + $0x30] sm:$0xf]  ;;  %v3372_v42 = vld [vmem:[#allocation12 + $0x34] sm:$0xf0]  ;;  %v2653_v43 = vor.u32 %v3371_v38, %v2650_v39  ;;  %v3369_v45 = vld [vmem:[#allocation12 + $0x24] sm:$0xf] }
  0x78   : > { %v2649_v44 = vor.u32 %v3372_v42, %v2648_v41  ;;  %v2642_v46 = vld [vmem:[#allocation12 + $0x28] sm:$0xf0]  ;;  %v3308_v49 = vld [vmem:[#allocation8] sm:$0xff]  ;;  %v3370_v52 = vld [vmem:[#allocation12 + $0x24] sm:$0xf0]  ;;  %vm817_vm8 = vcmask 1046528  }
  0x79   : > { %732 = vmatpush.bf16.msra.mxu0 %v3312_v15  ;;  %988 = vmatpush.bf16.msra.mxu2 %v2669_v25  ;;  %v3309_v47 = vld [vmem:[#allocation8 + $0x8] sm:$0xff]  ;;  %v2645_v48 = vor.u32 %v3369_v45, %v2642_v46  ;;  %v2640_v51 = vld [vmem:[#allocation12 + $0x20] sm:$0xf]  ;;  %v2808_v53 = vld [vmem:[#allocation11 + $0xf0] sm:$0xf]  ;;  %s4504_s23 = sld [smem:[#allocation33_spill]] }
  0x7a   : > { %974 = vmatpush.bf16.msra.mxu1 %v2665_v29  ;;  %v3307_v50 = vld [vmem:[%s4217_s14] sm:$0xff]  ;;  %v2641_v54 = vor.u32 %v3370_v52, %v2640_v51  ;;  %v3348_v55 = vld [vmem:[#allocation11 + $0xf4] sm:$0xf0]  ;;  %v3367_v56 = vld [vmem:[#allocation12 + $0x14] sm:$0xf]  ;;  %s4505_s9 = sld [smem:[#allocation35_spill]] }
  0x7b   : > { %650 = vperm.xlu0 %3613, %v642_v17   ;;  %1241 = vmatpush.bf16.msra.mxu3 %v2737_v35  ;;  %v2634_v57 = vld [vmem:[#allocation12 + $0x18] sm:$0xf0]  ;;  %v2809_v58 = vor.u32 %v3348_v55, %v2808_v53  ;;  %v2728_v60 = vld [vmem:[#allocation11 + $0x50] sm:$0xf]  ;;  %v3328_v61 = vld [vmem:[#allocation11 + $0x54] sm:$0xf0] }
  0x7c   : > { %v2637_v59 = vor.u32 %v3367_v56, %v2634_v57  ;;  %v2729_v62 = vor.u32 %v3328_v61, %v2728_v60  ;;  %v2632_v63 = vld [vmem:[#allocation12 + $0x10] sm:$0xf]  ;;  %v3368_v0 = vld [vmem:[#allocation12 + $0x14] sm:$0xf0]  ;;  %v2800_v1 = vld [vmem:[#allocation11 + $0xe0] sm:$0xf] }
  0x7d   : > { %733 = vmatpush.bf16.msra.mxu0 %v3311_v32  ;;  %989 = vmatpush.bf16.msra.mxu2 %v2661_v36  ;;  %v2633_v2 = vor.u32 %v3368_v0, %v2632_v63  ;;  %v3346_v3 = vld [vmem:[#allocation11 + $0xe4] sm:$0xf0]  ;;  %v3365_v4 = vld [vmem:[#allocation12 + $0x4] sm:$0xf]  ;;  %v2626_v5 = vld [vmem:[#allocation12 + $0x8] sm:$0xf0] }
  0x7e   : > { %975 = vmatpush.bf16.msra.mxu1 %v2657_v37  ;;  %v2801_v6 = vor.u32 %v3346_v3, %v2800_v1  ;;  %v2629_v7 = vor.u32 %v3365_v4, %v2626_v5  ;;  %v2720_v8 = vld [vmem:[#allocation11 + $0x40] sm:$0xf]  ;;  %v3326_v9 = vld [vmem:[#allocation11 + $0x44] sm:$0xf0]  ;;  %v3331_v10 = vld [vmem:[#allocation11 + $0x74] sm:$0xf] }
  0x7f   : > { %1242 = vmatpush.bf16.msra.mxu3 %v2729_v62  ;;  %v2721_v11 = vor.u32 %v3326_v9, %v2720_v8  ;;  %v2746_v12 = vld [vmem:[#allocation11 + $0x78] sm:$0xf0]  ;;  %v2624_v14 = vld [vmem:[#allocation12] sm:$0xf]  ;;  %v3366_v15 = vld [vmem:[#allocation12 + $0x4] sm:$0xf0] }
  0x80   : > { %v2749_v13 = vor.u32 %v3331_v10, %v2746_v12  ;;  %v2792_v16 = vld [vmem:[#allocation11 + $0xd0] sm:$0xf]  ;;  %v2625_v17 = vor.u32 %v3366_v15, %v2624_v14  ;;  %v3344_v18 = vld [vmem:[#allocation11 + $0xd4] sm:$0xf0]  ;;  %v3329_v25 = vld [vmem:[#allocation11 + $0x64] sm:$0xf] }
  0x81   : > { %734 = vmatpush.bf16.msra.mxu0 %v3310_v40  ;;  %990 = vmatpush.bf16.msra.mxu2 %v2653_v43  ;;  %v2712_v19 = vld [vmem:[#allocation11 + $0x30] sm:$0xf]  ;;  %v3324_v20 = vld [vmem:[#allocation11 + $0x34] sm:$0xf0]  ;;  %v2793_v21 = vor.u32 %v3344_v18, %v2792_v16  ;;  %v2738_v27 = vld [vmem:[#allocation11 + $0x68] sm:$0xf0] }
  0x82   : > { %976 = vmatpush.bf16.msra.mxu1 %v2649_v44  ;;  %v2713_v22 = vor.u32 %v3324_v20, %v2712_v19  ;;  %v2872_v23 = vld [vmem:[#allocation11 + $0x170] sm:$0xf]  ;;  %v3364_v24 = vld [vmem:[#allocation11 + $0x174] sm:$0xf0]  ;;  %v2741_v28 = vor.u32 %v3329_v25, %v2738_v27  ;;  %v2784_v29 = vld [vmem:[#allocation11 + $0xc0] sm:$0xf] }
  0x83   : > { %1243 = vmatpush.bf16.msra.mxu3 %v2721_v11  ;;  %v2873_v26 = vor.u32 %v3364_v24, %v2872_v23  ;;  %v3342_v30 = vld [vmem:[#allocation11 + $0xc4] sm:$0xf0]  ;;  %v2704_v32 = vld [vmem:[#allocation11 + $0x20] sm:$0xf]  ;;  %v3327_v37 = vld [vmem:[#allocation11 + $0x54] sm:$0xf] }
  0x84   : > { %v2785_v31 = vor.u32 %v3342_v30, %v2784_v29  ;;  %v3322_v33 = vld [vmem:[#allocation11 + $0x24] sm:$0xf0]  ;;  %v2864_v34 = vld [vmem:[#allocation11 + $0x160] sm:$0xf]  ;;  %v2730_v38 = vld [vmem:[#allocation11 + $0x58] sm:$0xf0] }
  0x85   : > { %735 = vmatpush.bf16.msra.mxu0 %v3309_v47  ;;  %991 = vmatpush.bf16.msra.mxu2 %v2645_v48  ;;  %v2705_v35 = vor.u32 %v3322_v33, %v2704_v32  ;;  %v3362_v36 = vld [vmem:[#allocation11 + $0x164] sm:$0xf0]  ;;  %v2733_v40 = vor.u32 %v3327_v37, %v2730_v38  ;;  %v2776_v41 = vld [vmem:[#allocation11 + $0xb0] sm:$0xf]  ;;  %v3340_v42 = vld [vmem:[#allocation11 + $0xb4] sm:$0xf0] }
  0x86   : > { %977 = vmatpush.bf16.msra.mxu1 %v2641_v54  ;;  %v2865_v39 = vor.u32 %v3362_v36, %v2864_v34  ;;  %v2777_v43 = vor.u32 %v3340_v42, %v2776_v41  ;;  %v2696_v44 = vld [vmem:[#allocation11 + $0x10] sm:$0xf]  ;;  %v3320_v45 = vld [vmem:[#allocation11 + $0x14] sm:$0xf0]  ;;  %v2722_v51 = vld [vmem:[#allocation11 + $0x48] sm:$0xf0] }
  0x87   : > { %1244 = vmatpush.bf16.msra.mxu3 %v2713_v22  ;;  %v2856_v46 = vld [vmem:[#allocation11 + $0x150] sm:$0xf]  ;;  %v2697_v47 = vor.u32 %v3320_v45, %v2696_v44  ;;  %v3360_v48 = vld [vmem:[#allocation11 + $0x154] sm:$0xf0]  ;;  %v2768_v53 = vld [vmem:[#allocation11 + $0xa0] sm:$0xf] }
  0x88   : > { %v3338_v54 = vld [vmem:[#allocation11 + $0xa4] sm:$0xf0]  ;;  %v2688_v55 = vld [vmem:[#allocation11] sm:$0xf]  ;;  %v4258_v57 = vld [vmem:[%s4224_s29] sm:$0xff]  ;;  %s3492_s16 = smul.u32 48, %s4213_s5 }
  0x89   : > { %736 = vmatpush.bf16.msra.mxu0 %v3308_v49  ;;  %992 = vmatpush.bf16.msra.mxu2 %v2637_v59  ;;  %v2857_v49 = vor.u32 %v3360_v48, %v2856_v46  ;;  %v2769_v56 = vor.u32 %v3338_v54, %v2768_v53  ;;  %v2848_v59 = vld [vmem:[#allocation11 + $0x140] sm:$0xf]  ;;  %v3358_v61 = vld [vmem:[#allocation11 + $0x144] sm:$0xf0]  ;;  %v3323_v62 = vld [vmem:[#allocation11 + $0x34] sm:$0xf] }
  0x8a   : > { %978 = vmatpush.bf16.msra.mxu1 %v2633_v2  ;;  %v2714_v63 = vld [vmem:[#allocation11 + $0x38] sm:$0xf0]  ;;  %v2849_v0 = vor.u32 %v3358_v61, %v2848_v59  ;;  %v3347_v2 = vld [vmem:[#allocation11 + $0xf4] sm:$0xf]  ;;  %v2760_v5 = vld [vmem:[#allocation11 + $0x90] sm:$0xf] }
  0x8b   : > { %1245 = vmatpush.bf16.msra.mxu3 %v2705_v35  ;;  %v2717_v1 = vor.u32 %v3323_v62, %v2714_v63  ;;  %v2810_v3 = vld [vmem:[#allocation11 + $0xf8] sm:$0xf0]  ;;  %v3356_v8 = vld [vmem:[#allocation11 + $0x134] sm:$0xf0]  ;;  %v3321_v11 = vld [vmem:[#allocation11 + $0x24] sm:$0xf] }
  0x8c   : > { %737 = vmatmul.bf16.vlgmr.msra.gmra.mxu0 %v3307_v50  ;;  %v3325_v50 = vld [vmem:[#allocation11 + $0x44] sm:$0xf]  ;;  %v2813_v4 = vor.u32 %v3347_v2, %v2810_v3  ;;  %v2706_v12 = vld [vmem:[#allocation11 + $0x28] sm:$0xf0]  ;;  %v2752_v16 = vld [vmem:[#allocation11 + $0x80] sm:$0xf] }
  0x8d   : > { %1254 = vmatpush.bf16.msrb.mxu0 %v2809_v58  ;;  %993 = vmatpush.bf16.msra.mxu2 %v2629_v7  ;;  %v2725_v52 = vor.u32 %v3325_v50, %v2722_v51  ;;  %v3318_v58 = vld [vmem:[#allocation11 + $0x4] sm:$0xf0]  ;;  %v2840_v7 = vld [vmem:[#allocation11 + $0x130] sm:$0xf]  ;;  %v2709_v14 = vor.u32 %v3321_v11, %v2706_v12  ;;  %v2802_v15 = vld [vmem:[#allocation11 + $0xe8] sm:$0xf0] }
  0x8e   : > { %979 = vmatpush.bf16.msra.mxu1 %v2625_v17  ;;  %v2689_v60 = vor.u32 %v3318_v58, %v2688_v55  ;;  %v2841_v10 = vor.u32 %v3356_v8, %v2840_v7  ;;  %v3334_v17 = vld [vmem:[#allocation11 + $0x84] sm:$0xf0]  ;;  %v2832_v20 = vld [vmem:[#allocation11 + $0x120] sm:$0xf]  ;;  %v3363_v22 = vld [vmem:[#allocation11 + $0x174] sm:$0xf] }
  0x8f   : > { %1246 = vmatpush.bf16.msra.mxu3 %v2697_v47  ;;  %v2753_v19 = vor.u32 %v3334_v17, %v2752_v16  ;;  %v2874_v24 = vld [vmem:[#allocation11 + $0x178] sm:$0xf0]  ;;  %v3319_v25 = vld [vmem:[#allocation11 + $0x14] sm:$0xf]  ;;  %v3352_v33 = vld [vmem:[#allocation11 + $0x114] sm:$0xf0] }
  0x90   : > { %994 = vmatmul.bf16.vlgmr.msra.gmra.mxu2 %v4258_v57  ;;  %v2877_v27 = vor.u32 %v3363_v22, %v2874_v24  ;;  %v3343_v29 = vld [vmem:[#allocation11 + $0xd4] sm:$0xf]  ;;  %v2794_v30 = vld [vmem:[#allocation11 + $0xd8] sm:$0xf0]  ;;  %v3361_v34 = vld [vmem:[#allocation11 + $0x164] sm:$0xf] }
  0x91   : > { %1255 = vmatpush.bf16.msrb.mxu0 %v2801_v6  ;;  %1282 = vmatpush.bf16.msrb.mxu2 %v2749_v13  ;;  %v3336_v6 = vld [vmem:[#allocation11 + $0x94] sm:$0xf0]  ;;  %v3345_v13 = vld [vmem:[#allocation11 + $0xe4] sm:$0xf]  ;;  %v2797_v32 = vor.u32 %v3343_v29, %v2794_v30  ;;  %v2866_v35 = vld [vmem:[#allocation11 + $0x168] sm:$0xf0] }
  0x92   : > { %1268 = vmatpush.bf16.msrb.mxu1 %v2873_v26  ;;  %v2761_v9 = vor.u32 %v3336_v6, %v2760_v5  ;;  %v2805_v18 = vor.u32 %v3345_v13, %v2802_v15  ;;  %v2698_v26 = vld [vmem:[#allocation11 + $0x18] sm:$0xf0]  ;;  %v3317_v36 = vld [vmem:[#allocation11 + $0x4] sm:$0xf]  ;;  %v2690_v37 = vld [vmem:[#allocation11 + $0x8] sm:$0xf0]  ;;  %v2869_v41 = vor.u32 %v3361_v34, %v2866_v35 }
  0x93   : > { %1247 = vmatpush.bf16.msra.mxu3 %v2689_v60  ;;  %980 = vmatmul.bf16.vlgmr.msra.gmra.mxu1 %v4258_v57  ;;  %v3341_v38 = vld [vmem:[#allocation11 + $0xc4] sm:$0xf]  ;;  %v2786_v42 = vld [vmem:[#allocation11 + $0xc8] sm:$0xf0]  ;;  %v2816_v47 = vld [vmem:[#allocation11 + $0x100] sm:$0xf] }
  0x94   : > { %v2789_v44 = vor.u32 %v3341_v38, %v2786_v42  ;;  %v3350_v48 = vld [vmem:[#allocation11 + $0x104] sm:$0xf0]  ;;  %v3339_v53 = vld [vmem:[#allocation11 + $0xb4] sm:$0xf]  ;;  %v2778_v54 = vld [vmem:[#allocation11 + $0xb8] sm:$0xf0] }
  0x95   : > { %1256 = vmatpush.bf16.msrb.mxu0 %v2793_v21  ;;  %1283 = vmatpush.bf16.msrb.mxu2 %v2741_v28  ;;  %v3354_v21 = vld [vmem:[#allocation11 + $0x124] sm:$0xf0]  ;;  %v2701_v28 = vor.u32 %v3319_v25, %v2698_v26  ;;  %v2817_v51 = vor.u32 %v3350_v48, %v2816_v47  ;;  %v3357_v59 = vld [vmem:[#allocation11 + $0x144] sm:$0xf]  ;;  %v2850_v60 = vld [vmem:[#allocation11 + $0x148] sm:$0xf0] }
  0x96   : > { %1269 = vmatpush.bf16.msrb.mxu1 %v2865_v39  ;;  %v2833_v23 = vor.u32 %v3354_v21, %v2832_v20  ;;  %v3614_v39 = vld [vmem:[#allocation9] ss:$0 sm:$0xff]  ;;  %v2853_v62 = vor.u32 %v3357_v59, %v2850_v60  ;;  %v3337_v63 = vld [vmem:[#allocation11 + $0xa4] sm:$0xf]  ;;  %vm776_vm1 = vsmask.f32 7938 }
  0x97   : > { %1296 = vmatpush.bf16.msrb.mxu3 %v2813_v4  ;;  %v778_v3 = vld [vmem:[#allocation2] sm:$0xf]  ;;  %v2842_v6 = vld [vmem:[#allocation11 + $0x138] sm:$0xf0]  ;;  %vm4269_vm2 = vmand %vm775_vm0, %vm776_vm1  ;;  %vm752_vm3 = vsmask.f32 256 }
  0x98   : > { %v3355_v5 = vld [vmem:[#allocation11 + $0x134] sm:$0xf]  ;;  %v2762_v12 = vld [vmem:[#allocation11 + $0x98] sm:$0xf0]  ;;  %v3353_v16 = vld [vmem:[#allocation11 + $0x124] sm:$0xf] }
  0x99   : > { %1257 = vmatpush.bf16.msrb.mxu0 %v2785_v31  ;;  %1284 = vmatpush.bf16.msrb.mxu2 %v2733_v40  ;;  %v2824_v31 = vld [vmem:[#allocation11 + $0x110] sm:$0xf]  ;;  %v3335_v11 = vld [vmem:[#allocation11 + $0x94] sm:$0xf]  ;;  %v2834_v17 = vld [vmem:[#allocation11 + $0x128] sm:$0xf0] }
  0x9a   : > { %1270 = vmatpush.bf16.msrb.mxu1 %v2857_v49  ;;  %v2825_v40 = vor.u32 %v3352_v33, %v2824_v31  ;;  %v3359_v49 = vld [vmem:[#allocation11 + $0x154] sm:$0xf]  ;;  %v2765_v15 = vor.u32 %v3335_v11, %v2762_v12  ;;  %v3333_v20 = vld [vmem:[#allocation11 + $0x84] sm:$0xf]  ;;  %v2754_v21 = vld [vmem:[#allocation11 + $0x88] sm:$0xf0]  ;;  %v2837_v24 = vor.u32 %v3353_v16, %v2834_v17 }
  0x9b   : > { %1297 = vmatpush.bf16.msrb.mxu3 %v2805_v18  ;;  %vm753_vm4 = vsmask.f32 4368  ;;  %v2757_v25 = vor.u32 %v3333_v20, %v2754_v21  ;;  %v2826_v29 = vld [vmem:[#allocation11 + $0x118] sm:$0xf0]  ;;  %vm4288_vm7 = vmand %vm782_vm5, %vm752_vm3  ;;  %v784_v34 = vld [vmem:[#allocation2 + $0x8] sm:$0x1] }
  0x9c   : > { %vm4283_vm6 = vmor %vm752_vm3, %vm753_vm4  ;;  %v3349_v35 = vld [vmem:[#allocation11 + $0x104] sm:$0xf]  ;;  %vm800_vm9 = vsmask.f32 7424  ;;  %v3394_v16 = vld [vmem:[#allocation14 + $0x64] sm:$0xf0] }
  0x9d   : > { %1258 = vmatpush.bf16.msrb.mxu0 %v2777_v43  ;;  %1285 = vmatpush.bf16.msrb.mxu2 %v2725_v52  ;;  %v2693_v43 = vor.u32 %v3317_v36, %v2690_v37  ;;  %v2858_v52 = vld [vmem:[#allocation11 + $0x158] sm:$0xf0]  ;;  %v2818_v36 = vld [vmem:[#allocation11 + $0x108] sm:$0xf0]  ;;  %v3393_v17 = vld [vmem:[#allocation14 + $0x64] sm:$0xf] }
  0x9e   : > { %1271 = vmatpush.bf16.msrb.mxu1 %v2849_v0  ;;  %v2861_v55 = vor.u32 %v3359_v49, %v2858_v52  ;;  %v2770_v0 = vld [vmem:[#allocation11 + $0xa8] sm:$0xf0]  ;;  %v2821_v42 = vor.u32 %v3349_v35, %v2818_v36  ;;  %v3389_v35 = vld [vmem:[#allocation14 + $0x44] sm:$0xf]  ;;  %s629_s29 = scalar_lea.vmem [#allocation17], %s3492_s16  ;;  %s4506_s19 = sld [smem:[#allocation27_spill]] }
  0x9f   : > { %1298 = vmatpush.bf16.msrb.mxu3 %v2797_v32  ;;  %v2932_v20 = vld [vmem:[#allocation14 + $0x68] sm:$0xf0]  ;;  %s3493_s3 = smul.u32 48, %s4078_s15  ;;  %s4507_s20 = sld [smem:[#allocation36_spill]] }
  0xa0   : > { %v2935_v21 = vor.u32 %v3393_v17, %v2932_v20  ;;  %v3381_v17 = vld [vmem:[#allocation14 + $0x4] sm:$0xf]  ;;  %s2362_s15 = scalar_lea.sflag [#allocation5], %s4213_s5 }
  0xa1   : > { %1259 = vmatpush.bf16.msrb.mxu0 %v2769_v56  ;;  %1286 = vmatpush.bf16.msrb.mxu2 %v2717_v1  ;;  %v2781_v56 = vor.u32 %v3339_v53, %v2778_v54  ;;  %v2773_v1 = vor.u32 %v3337_v63, %v2770_v0 }
  0xa2   : > { %1272 = vmatpush.bf16.msrb.mxu1 %v2841_v10  ;;  %v2845_v10 = vor.u32 %v3355_v5, %v2842_v6  ;;  %v3396_v5 = vld [vmem:[#allocation14 + $0x74] sm:$0xf0]  ;;  %v3395_v6 = vld [vmem:[#allocation14 + $0x74] sm:$0xf] }
  0xa3   : > { %1299 = vmatpush.bf16.msrb.mxu3 %v2789_v44 }
  0xa4   : > { %s639_s13 = scalar_lea.vmem %s4506_s19, %s3305_s24  ;;  %s2374_s24 = sshll.u32 %s629_s29, 4  ;;  %s2375_s24 = int_to_ptr.vmem [resolvable:$true] %s2374_s24 }
  0xa5   : > { %1260 = vmatpush.bf16.msrb.mxu0 %v2761_v9  ;;  %1287 = vmatpush.bf16.msrb.mxu2 %v2709_v14  ;;  %s2373_s21 = scalar_lea.hbm %s4507_s20, %s3493_s3 }
  0xa6   : > { %1273 = vmatpush.bf16.msrb.mxu1 %v2833_v23  ;;  %s2376_s30 = sshll.u32 %s2373_s21, 4  ;;  %s2377_s30 = int_to_ptr.hbm [resolvable:$true] %s2376_s30 }
  0xa7   : > { %1300 = vmatpush.bf16.msrb.mxu3 %v2781_v56  ;;  %s3897_s11 = sshra.s32 %s2377_s30, 4  ;;  %s3898_s11 = int_to_ptr.hbm [resolvable:$true] %s3897_s11 }
  0xa8   : > { %s3899_s4 = scalar_lea.hbm %s3898_s11, 48  ;;  %p3904_p9 = scmp.lt.s32.totalorder %s3898_s11, %s4507_s20 }
  0xa9   : > { %1261 = vmatpush.bf16.msrb.mxu0 %v2753_v19  ;;  %1288 = vmatpush.bf16.msrb.mxu2 %v2701_v28  ;;  %v3351_v28 = vld [vmem:[#allocation11 + $0x114] sm:$0xf]  ;;  %p3900_p1 = scmp.ne.s32.totalorder %s3898_s11, %s3899_s4 }
  0xaa   : > { %1274 = vmatpush.bf16.msrb.mxu1 %v2825_v40  ;;  %v2829_v33 = vor.u32 %v3351_v28, %v2826_v29 }
  0xab   : > { %1301 = vmatpush.bf16.msrb.mxu3 %v2773_v1  ;;  %p3901_p12 = pnand %p3900_p1, %p4154_p4 }
  0xad   : > { %1310 = vmatpush.bf16.msra.mxu0 %v2877_v27  ;;  %1289 = vmatpush.bf16.msrb.mxu2 %v2693_v43  ;;  %p3902_p7 = pneg %p3901_p12 }
  0xae   : > { %1275 = vmatpush.bf16.msrb.mxu1 %v2817_v51 }
  0xaf   : > { %1302 = vmatpush.bf16.msrb.mxu3 %v2765_v15  ;;  %v2930_v15 = vld [vmem:[#allocation14 + $0x60] sm:$0xf] }
  0xb1   : > { %1311 = vmatpush.bf16.msra.mxu0 %v2869_v41 }
  0xb3   : > { %1303 = vmatpush.bf16.msrb.mxu3 %v2757_v25 }
  0xb5   : > { %1312 = vmatpush.bf16.msra.mxu0 %v2861_v55 }
  0xb9   : > { %1313 = vmatpush.bf16.msra.mxu0 %v2853_v62 }
  0xbd   : > { %1314 = vmatpush.bf16.msra.mxu0 %v2845_v10 }
  0xc1   : > { %1315 = vmatpush.bf16.msra.mxu0 %v2837_v24  ;;  %v3391_v24 = vld [vmem:[#allocation14 + $0x54] sm:$0xf] }
  0xc5   : > { %1316 = vmatpush.bf16.msra.mxu0 %v2829_v33  ;;  %v2914_v33 = vld [vmem:[#allocation14 + $0x40] sm:$0xf] }
  0xc9   : > { %1317 = vmatpush.bf16.msra.mxu0 %v2821_v42  ;;  %v3387_v42 = vld [vmem:[#allocation14 + $0x34] sm:$0xf] }
  0xe5   : > { %v4262_v45 = vpop.permute.xlu0 %645 }
  0xed   : > { %v4273_v14 = vpop.permute.xlu0 %650 }
 0x109   : > { %v738_v46 = vpop.f32.mrf.mxu0 }
 0x10a   : > { %v739_v50 = vadd.f32 %v3614_v39, %v738_v46 }
 0x10c   : > { %v4265_v58 = vmul.f32 %v739_v50, %v4262_v45 }
 0x10e   : > { %v750_v61 = vpack.c.bf16 %v4265_v58, %v4265_v58 }
 0x110   : > { %v756_v2 = vshrl.u32 %v750_v61, 16  ;;  %v759_v8 = vshll.u32 %v750_v61, 16 }
 0x111   : > { %v740_v4 = vpop.f32.mrf.mxu0 }
 0x112   : > { %v758_v7 = vrot.slane %v756_v2, 7  ;;  %v741_v9 = vadd.f32 %v3614_v39, %v740_v4  ;;  %v2938_v4 = vld [vmem:[#allocation14 + $0x70] sm:$0xf] }
 0x114   : > { %v761_v18 = vor.u32 %v759_v8, %v758_v7  ;;  %v4276_v19 = vmul.f32 %v741_v9, %v4273_v14  ;;  %v762_v37 = vrot.slane %v758_v7, 4  ;;  %v2939_v7 = vor.u32 %v3396_v5, %v2938_v4  ;;  %v2940_v8 = vld [vmem:[#allocation14 + $0x78] sm:$0xf0] }
 0x115   : > { %v2943_v11 = vor.u32 %v3395_v6, %v2940_v8  ;;  %v3382_v8 = vld [vmem:[#allocation14 + $0x4] sm:$0xf0] }
 0x116   : > { %v779_v22 = vsel %vm4269_vm2, %v761_v18, %v778_v3  ;;  %v751_v23 = vpack.c.bf16 %v4276_v19, %v4276_v19  ;;  %v995_v3 = vpop.f32.mrf.mxu2  ;;  %1479 = vmatpush.bf16.msra.mxu1 %v2939_v7  ;;  %v2931_v18 = vor.u32 %v3394_v16, %v2930_v15  ;;  %v2882_v7 = vld [vmem:[#allocation14] sm:$0xf] }
 0x117   : > { %780 = vst [vmem:[#allocation2] sm:$0xf] %v779_v22  ;;  %1493 = vmatpush.bf16.msra.mxu2 %v2943_v11  ;;  %v2922_v22 = vld [vmem:[#allocation14 + $0x50] sm:$0xf] }
 0x118   : > { %v764_v26 = vshrl.u32 %v751_v23, 16  ;;  %v767_v31 = vshll.u32 %v751_v23, 16  ;;  %v3392_v23 = vld [vmem:[#allocation14 + $0x54] sm:$0xf0] }
 0x119   : > { %v2923_v25 = vor.u32 %v3392_v23, %v2922_v22  ;;  %v2883_v23 = vor.u32 %v3382_v8, %v2882_v7  ;;  %v3454_v7 = vld [vmem:[#allocation12 + $0xc4] sm:$0xf0] }
 0x11a   : > { %v766_v30 = vrot.slane %v764_v26, 7  ;;  %1480 = vmatpush.bf16.msra.mxu1 %v2931_v18  ;;  %v2924_v26 = vld [vmem:[#allocation14 + $0x58] sm:$0xf0]  ;;  %v2884_v18 = vld [vmem:[#allocation14 + $0x8] sm:$0xf0] }
 0x11b   : > { %1494 = vmatpush.bf16.msra.mxu2 %v2935_v21  ;;  %v2927_v29 = vor.u32 %v3391_v24, %v2924_v26  ;;  %v2887_v24 = vor.u32 %v3381_v17, %v2884_v18 }
 0x11c   : > { %v769_v38 = vor.u32 %v767_v31, %v766_v30  ;;  %v771_v39 = vrot.slane %v766_v30, 4 }
 0x11e   : > { %v770_v40 = vsel %vm4283_vm6, %v762_v37, %v769_v38  ;;  %v785_v41 = vsel %vm4288_vm7, %v771_v39, %v784_v34  ;;  %v4296_v43 = vld [vmem:[#allocation2] sm:$0xf]  ;;  %v4301_v9 = vpop.f32.mrf.mxu2  ;;  %1481 = vmatpush.bf16.msra.mxu1 %v2923_v25  ;;  %v3390_v34 = vld [vmem:[#allocation14 + $0x44] sm:$0xf0]  ;;  %v2916_v37 = vld [vmem:[#allocation14 + $0x48] sm:$0xf0]  ;;  %v4311_v39 = vpop.f32.mrf.mxu1 }
 0x11f   : > { %781 = vst [vmem:[#allocation2 + $0x4] sm:$0xf] %v770_v40  ;;  %v790_v44 = vld [vmem:[#allocation2] sm:$0xe]  ;;  %v793_v47 = vunpack.c.l.b16 %v4296_v43  ;;  %1495 = vmatpush.bf16.msra.mxu2 %v2927_v29  ;;  %v2915_v36 = vor.u32 %v3390_v34, %v2914_v33  ;;  %v2919_v38 = vor.u32 %v3389_v35, %v2916_v37  ;;  %v3004_v34 = vld [vmem:[#allocation12 + $0xf8] sm:$0xf0] }
 0x120   : > { %786 = vst [vmem:[#allocation2 + $0x8] sm:$0x1] %v785_v41  ;;  %v815_v50 = vunpack.c.l.b16 %v790_v44  ;;  %v2906_v40 = vld [vmem:[#allocation14 + $0x30] sm:$0xf]  ;;  %v3388_v41 = vld [vmem:[#allocation14 + $0x34] sm:$0xf0] }
 0x121   : > { %v3459_v33 = vld [vmem:[#allocation12 + $0xf4] sm:$0xf]  ;;  %v2996_v37 = vld [vmem:[#allocation12 + $0xe8] sm:$0xf0] }
 0x122   : > { %1482 = vmatpush.bf16.msra.mxu1 %v2915_v36  ;;  %v3007_v35 = vor.u32 %v3459_v33, %v3004_v34  ;;  %v3457_v36 = vld [vmem:[#allocation12 + $0xe4] sm:$0xf]  ;;  %v2970_v34 = vld [vmem:[#allocation12 + $0xb0] sm:$0xf] }
 0x123   : > { %1496 = vmatpush.bf16.msra.mxu2 %v2919_v38 }
 0x126   : > { %v788_v46 = vld [vmem:[#allocation2 + $0x4] sm:$0xf]  ;;  %v983_v11 = vpop.f32.mrf.mxu1 }
 0x127   : > { %v794_v48 = vunpack.c.l.b16 %v788_v46  ;;  %v789_v49 = vld [vmem:[#allocation2 + $0x8] sm:$0x1]  ;;  %v2907_v46 = vor.u32 %v3388_v41, %v2906_v40  ;;  %v3002_v40 = vld [vmem:[#allocation12 + $0xf0] sm:$0xf] }
 0x128   : > { %v798_v51 = vunpack.c.l.b16 %v789_v49  ;;  %v3460_v41 = vld [vmem:[#allocation12 + $0xf4] sm:$0xf0] }
 0x129   : > { %v795_v52 = vpack.c.b16 %v794_v48, %v793_v47  ;;  %v816_v53 = vpack.c.b16 %v794_v48, %v815_v50  ;;  %v2908_v47 = vld [vmem:[#allocation14 + $0x38] sm:$0xf0]  ;;  %v4316_v48 = vld [vmem:[%s4457_s7] sm:$0x3]  ;;  %1483 = vmatpush.bf16.msra.mxu1 %v2907_v46 }
 0x12a   : > { %v799_v54 = vpack.c.b16 %v798_v51, %v798_v51  ;;  %v2911_v50 = vor.u32 %v3387_v42, %v2908_v47  ;;  %v2999_v42 = vor.u32 %v3457_v36, %v2996_v37  ;;  %v3003_v47 = vor.u32 %v3460_v41, %v3002_v40  ;;  %v2964_v37 = vld [vmem:[#allocation12 + $0xa8] sm:$0xf0] }
 0x12b   : > { %1248 = vmatmul.bf16.vlgmr.msra.gmra.mxu3 %v795_v52  ;;  %1290 = vmatmul.bf16.vlgmr.msrb.gmra.mxu2 %v795_v52  ;;  %v818_v55 = vrot.slane %v816_v53, 1  ;;  %v804_v56 = vshll.u32 %v795_v52, 16  ;;  %v802_v61 = vshrl.u32 %v795_v52, 16  ;;  %v1327_v53 = vperm.slane %v4316_v48, 1 }
 0x12c   : > { %v819_v59 = vrot.slane %v799_v54, 1  ;;  %v809_v60 = vshll.u32 %v799_v54, 16  ;;  %1497 = vmatpush.bf16.msra.mxu2 %v2911_v50  ;;  %v2898_v54 = vld [vmem:[#allocation14 + $0x20] sm:$0xf]  ;;  %1720 = vmatpush.bf16.msra.mxu3 %v3003_v47 }
 0x12d   : > { %v806_v62 = vrot.slane %v804_v56, 1  ;;  %v3385_v56 = vld [vmem:[#allocation14 + $0x24] sm:$0xf]  ;;  %v2994_v50 = vld [vmem:[#allocation12 + $0xe0] sm:$0xf] }
 0x12e   : > { %v820_v63 = vsel %vm817_vm8, %v818_v55, %v819_v59  ;;  %v811_v1 = vrot.slane %v809_v60, 1  ;;  %v3386_v55 = vld [vmem:[#allocation14 + $0x24] sm:$0xf0] }
 0x12f   : > { %1276 = vmatmul.bf16.vlgmr.msrb.gmra.mxu1 %v820_v63  ;;  %v807_v0 = vor.u32 %v806_v62, %v802_v61  ;;  %v2899_v60 = vor.u32 %v3386_v55, %v2898_v54  ;;  %v2900_v61 = vld [vmem:[#allocation14 + $0x28] sm:$0xf0]  ;;  %v2890_v62 = vld [vmem:[#allocation14 + $0x10] sm:$0xf] }
 0x130   : > { %v2986_v54 = vld [vmem:[#allocation12 + $0xd0] sm:$0xf] }
 0x131   : > { %v812_v2 = vsel %vm800_vm9, %v807_v0, %v811_v1  ;;  %v2903_v1 = vor.u32 %v3385_v56, %v2900_v61  ;;  %1484 = vmatpush.bf16.msra.mxu1 %v2899_v60  ;;  %v3456_v56 = vld [vmem:[#allocation12 + $0xd4] sm:$0xf0] }
 0x132   : > { %1262 = vmatmul.bf16.vlgmr.msrb.gmra.mxu0 %v812_v2  ;;  %v3412_v60 = vld [vmem:[#allocation11 + $0x1f4] sm:$0xf0] }
 0x133   : > { %1498 = vmatpush.bf16.msra.mxu2 %v2903_v1  ;;  %1734 = vmatpush.bf16.msrb.mxu0 %v3007_v35  ;;  %v3452_v35 = vld [vmem:[#allocation12 + $0xb4] sm:$0xf0] }
 0x137   : > { %1735 = vmatpush.bf16.msrb.mxu0 %v2999_v42 }
 0x13b   : > { %1304 = vmatmul.bf16.vlgmr.msrb.gmra.mxu3 %v812_v2  ;;  %v3383_v2 = vld [vmem:[#allocation14 + $0x14] sm:$0xf] }
 0x142   : > { %1318 = vmatmul.bf16.vlgmr.msra.gmra.mxu0 %v820_v63  ;;  %v3384_v63 = vld [vmem:[#allocation14 + $0x14] sm:$0xf0] }
 0x143   : > { %v2891_v5 = vor.u32 %v3384_v63, %v2890_v62  ;;  %v3453_v63 = vld [vmem:[#allocation12 + $0xc4] sm:$0xf] }
 0x145   : > { %1485 = vmatpush.bf16.msra.mxu1 %v2891_v5  ;;  %v2987_v5 = vor.u32 %v3456_v56, %v2986_v54  ;;  %v2956_v54 = vld [vmem:[#allocation12 + $0x98] sm:$0xf0] }
 0x149   : > { %1486 = vmatpush.bf16.msra.mxu1 %v2883_v23 }
 0x1ac   : > { %v1277_v38 = vpop.f32.mrf.mxu1 }
 0x1ae   : > { %v4303_v10 = vpop.f32.mrf.mxu3  ;;  %v1291_v31 = vpop.f32.mrf.mxu2 }
 0x1af   : > { %v4305_v12 = vpop.f32.mrf.mxu0  ;;  %v1292_v44 = vadd.f32 %v1291_v31, %v995_v3  ;;  %v2892_v3 = vld [vmem:[#allocation14 + $0x18] sm:$0xf0]  ;;  %v1250_v46 = vadd.f32 %v4303_v10, %v4311_v39 }
 0x1b0   : > { %v2895_v6 = vor.u32 %v3383_v2, %v2892_v3  ;;  %v3410_v3 = vld [vmem:[#allocation11 + $0x1e4] sm:$0xf0] }
 0x1b1   : > { %v1264_v62 = vadd.f32 %v4305_v12, %v1250_v46  ;;  %v2971_v46 = vor.u32 %v3452_v35, %v2970_v34  ;;  %v3409_v34 = vld [vmem:[#allocation11 + $0x1e4] sm:$0xf] }
 0x1b2   : > { %1499 = vmatpush.bf16.msra.mxu2 %v2895_v6  ;;  %v2978_v6 = vld [vmem:[#allocation12 + $0xc0] sm:$0xf] }
 0x1b3   : > { %v2979_v23 = vor.u32 %v3454_v7, %v2978_v6  ;;  %v3445_v7 = vld [vmem:[#allocation12 + $0x84] sm:$0xf] }
 0x1b4   : > { %v1279_v17 = vpop.f32.mrf.mxu1 }
 0x1b6   : > { %v4307_v28 = vpop.f32.mrf.mxu3  ;;  %v1293_v0 = vpop.f32.mrf.mxu2  ;;  %1500 = vmatpush.bf16.msra.mxu2 %v2887_v24  ;;  %v3130_v24 = vld [vmem:[#allocation11 + $0x270] sm:$0xf] }
 0x1b7   : > { %v4309_v30 = vpop.f32.mrf.mxu0  ;;  %v1294_v15 = vadd.f32 %v1293_v0, %v4301_v9  ;;  %v2980_v0 = vld [vmem:[#allocation12 + $0xc8] sm:$0xf0] }
 0x1b8   : > { %v2983_v8 = vor.u32 %v3453_v63, %v2980_v0 }
 0x1be   : > { %v1305_v49 = vpop.f32.mrf.mxu3 }
 0x1bf   : > { %v1306_v51 = vadd.f32 %v1305_v49, %v1292_v44  ;;  %v1319_v52 = vpop.f32.mrf.mxu0  ;;  %v3455_v44 = vld [vmem:[#allocation12 + $0xd4] sm:$0xf]  ;;  %v2988_v49 = vld [vmem:[#allocation12 + $0xd8] sm:$0xf0] }
 0x1c0   : > { %v2991_v55 = vor.u32 %v3455_v44, %v2988_v49 }
 0x1c1   : > { %v1320_v59 = vadd.f32 %v1319_v52, %v1306_v51  ;;  %v3458_v51 = vld [vmem:[#allocation12 + $0xe4] sm:$0xf0]  ;;  %v1252_v52 = vadd.f32 %v4307_v28, %v983_v11  ;;  %v3058_v28 = vld [vmem:[#allocation11 + $0x1e0] sm:$0xf]  ;;  %v3451_v11 = vld [vmem:[#allocation12 + $0xb4] sm:$0xf] }
 0x1c2   : > { %v3059_v12 = vor.u32 %v3410_v3, %v3058_v28  ;;  %1736 = vmatpush.bf16.msrb.mxu0 %v2991_v55 }
 0x1c3   : > { %v1331_v4 = vadd.f32 %v1327_v53, %v1320_v59  ;;  %v3066_v59 = vld [vmem:[#allocation11 + $0x1f0] sm:$0xf]  ;;  %v1266_v1 = vadd.f32 %v4309_v30, %v1252_v52  ;;  %v1278_v30 = vadd.f32 %v1277_v38, %v1264_v62 }
 0x1c4   : > { %v3067_v10 = vor.u32 %v3412_v60, %v3066_v59 }
 0x1c5   : > { %v2878_v16 = vmul.f32 -1.442695, %v1331_v4 }
 0x1c6   : > { %v1307_v20 = vpop.f32.mrf.mxu3  ;;  %1988 = vmatpush.bf16.msrb.mxu1 %v3067_v10  ;;  %1737 = vmatpush.bf16.msrb.mxu0 %v2983_v8  ;;  %v3042_v8 = vld [vmem:[#allocation11 + $0x1c0] sm:$0xf] }
 0x1c7   : > { %3615 = vpow2.f32 %v2878_v16  ;;  %v1308_v21 = vadd.f32 %v1307_v20, %v1294_v15  ;;  %v1321_v22 = vpop.f32.mrf.mxu0  ;;  %v2972_v15 = vld [vmem:[#allocation12 + $0xb8] sm:$0xf0]  ;;  %v1326_v16 = vperm.slane %v4316_v48, 0  ;;  %v3050_v20 = vld [vmem:[#allocation11 + $0x1d0] sm:$0xf] }
 0x1c8   : > { %v2975_v33 = vor.u32 %v3451_v11, %v2972_v15  ;;  %v3449_v48 = vld [vmem:[#allocation12 + $0xa4] sm:$0xf]  ;;  %v3122_v15 = vld [vmem:[#allocation11 + $0x260] sm:$0xf] }
 0x1c9   : > { %v1322_v25 = vadd.f32 %v1321_v22, %v1308_v21  ;;  %v3408_v21 = vld [vmem:[#allocation11 + $0x1d4] sm:$0xf0]  ;;  %v1280_v22 = vadd.f32 %v1279_v17, %v1266_v1  ;;  %v1330_v36 = vadd.f32 %v1326_v16, %v1278_v30  ;;  %v2967_v49 = vor.u32 %v3449_v48, %v2964_v37  ;;  %v3426_v30 = vld [vmem:[#allocation11 + $0x264] sm:$0xf0]  ;;  %v2946_v37 = vld [vmem:[#allocation12 + $0x80] sm:$0xf] }
 0x1ca   : > { %1989 = vmatpush.bf16.msrb.mxu1 %v3059_v12  ;;  %1738 = vmatpush.bf16.msrb.mxu0 %v2975_v33  ;;  %v2948_v12 = vld [vmem:[#allocation12 + $0x88] sm:$0xf0]  ;;  %v3123_v17 = vor.u32 %v3426_v30, %v3122_v15  ;;  %v3424_v33 = vld [vmem:[#allocation11 + $0x254] sm:$0xf0]  ;;  %v3403_v15 = vld [vmem:[#allocation11 + $0x1b4] sm:$0xf] }
 0x1cb   : > { %v1333_v26 = vadd.f32 %v1327_v53, %v1322_v25  ;;  %v2995_v53 = vor.u32 %v3458_v51, %v2994_v50  ;;  %v3428_v25 = vld [vmem:[#allocation11 + $0x274] sm:$0xf0]  ;;  %v1332_v40 = vadd.f32 %v1326_v16, %v1280_v22  ;;  %v2962_v50 = vld [vmem:[#allocation12 + $0xa0] sm:$0xf]  ;;  %v3450_v51 = vld [vmem:[#allocation12 + $0xa4] sm:$0xf0]  ;;  %v2951_v11 = vor.u32 %v3445_v7, %v2948_v12 }
 0x1cc   : > { %v2954_v22 = vld [vmem:[#allocation12 + $0x90] sm:$0xf]  ;;  %v3440_v7 = vld [vmem:[#allocation11 + $0x2d4] sm:$0xf0]  ;;  %v3090_v12 = vld [vmem:[#allocation11 + $0x220] sm:$0xf] }
 0x1cd   : > { %v3616_v29 = vpop.eup %3615  ;;  %v2879_v31 = vmul.f32 -1.442695, %v1333_v26  ;;  %1721 = vmatpush.bf16.msra.mxu3 %v2995_v53  ;;  %v3447_v53 = vld [vmem:[#allocation12 + $0x94] sm:$0xf]  ;;  %v3036_v30 = vld [vmem:[#allocation11 + $0x1b8] sm:$0xf0] }
 0x1ce   : > { %v4320_v9 = vadd.f32 1.0, %v3616_v29  ;;  %v3051_v29 = vor.u32 %v3408_v21, %v3050_v20  ;;  %1739 = vmatpush.bf16.msrb.mxu0 %v2967_v49  ;;  %v2959_v63 = vor.u32 %v3447_v53, %v2956_v54  ;;  %v3068_v20 = vld [vmem:[#allocation11 + $0x1f8] sm:$0xf0]  ;;  %v3106_v49 = vld [vmem:[#allocation11 + $0x240] sm:$0xf] }
 0x1cf   : > { %3617 = vpow2.f32 %v2879_v31  ;;  %v3131_v31 = vor.u32 %v3428_v25, %v3130_v24  ;;  %v3034_v25 = vld [vmem:[#allocation11 + $0x1b0] sm:$0xf]  ;;  %v3052_v53 = vld [vmem:[#allocation11 + $0x1d8] sm:$0xf0] }
 0x1d0   : > { %3619 = vrcp.f32 %v4320_v9  ;;  %v1353_v41 = vand.u32 2147483647, %v4320_v9  ;;  %1990 = vmatpush.bf16.msrb.mxu1 %v3051_v29  ;;  %v1355_v47 = vand.u32 2147483648, %v4320_v9  ;;  %vm1349_vm11 = vweird.f32 %v4320_v9 }
 0x1d1   : > { %1722 = vmatpush.bf16.msra.mxu3 %v2987_v5  ;;  %2002 = vmatpush.bf16.msrb.mxu2 %v3131_v31  ;;  %v3114_v31 = vld [vmem:[#allocation11 + $0x250] sm:$0xf] }
 0x1d2   : > { %v1356_v62 = vor.u32 1.1754944e-38, %v1355_v47  ;;  %vm1354_vm14 = vcmp.eq.f32.partialorder %v1353_v41, 8.507059e+37  ;;  %1740 = vmatpush.bf16.msrb.mxu0 %v2959_v63  ;;  %v3115_v35 = vor.u32 %v3424_v33, %v3114_v31  ;;  %v3026_v41 = vld [vmem:[#allocation11 + $0x1a0] sm:$0xf]  ;;  %v3444_v47 = vld [vmem:[#allocation11 + $0x2f4] sm:$0xf0] }
 0x1d3   : > { %v3098_v63 = vld [vmem:[#allocation11 + $0x230] sm:$0xf]  ;;  %v3425_v31 = vld [vmem:[#allocation11 + $0x264] sm:$0xf]  ;;  %v3124_v33 = vld [vmem:[#allocation11 + $0x268] sm:$0xf0] }
 0x1d5   : > { %v3618_v61 = vpop.eup %3617  ;;  %1723 = vmatpush.bf16.msra.mxu3 %v2979_v23  ;;  %v3448_v23 = vld [vmem:[#allocation12 + $0x94] sm:$0xf0]  ;;  %2003 = vmatpush.bf16.msrb.mxu2 %v3123_v17  ;;  %v3039_v17 = vor.u32 %v3403_v15, %v3036_v30 }
 0x1d6   : > { %v4327_v39 = vpop.eup %3619  ;;  %v4330_v2 = vadd.f32 1.0, %v3618_v61  ;;  %v2963_v61 = vor.u32 %v3450_v51, %v2962_v50  ;;  %1741 = vmatpush.bf16.msrb.mxu0 %v2951_v11  ;;  %v2955_v24 = vor.u32 %v3448_v23, %v2954_v22  ;;  %v3422_v51 = vld [vmem:[#allocation11 + $0x244] sm:$0xf0]  ;;  %v3082_v23 = vld [vmem:[#allocation11 + $0x210] sm:$0xf] }
 0x1d7   : > { %v1345_v4 = vmul.f32 %v4327_v39, %v4320_v9  ;;  %vm1350_vm10 = vweird.f32 %v4327_v39  ;;  %v3107_v54 = vor.u32 %v3422_v51, %v3106_v49  ;;  %v3116_v49 = vld [vmem:[#allocation11 + $0x258] sm:$0xf0] }
 0x1d8   : > { %3621 = vrcp.f32 %v4330_v2  ;;  %vm1351_vm12 = vmor %vm1349_vm11, %vm1350_vm10  ;;  %v1368_v55 = vand.u32 2147483647, %v4330_v2  ;;  %v1370_v56 = vand.u32 2147483648, %v4330_v2  ;;  %vm1364_vm15 = vweird.f32 %v4330_v2 }
 0x1d9   : > { %v1346_v18 = vsub.f32 1.0, %v1345_v4  ;;  %3623 = vtanh.f32 %v1330_v36  ;;  %1724 = vmatpush.bf16.msra.mxu3 %v2971_v46  ;;  %v3060_v36 = vld [vmem:[#allocation11 + $0x1e8] sm:$0xf0]  ;;  %1742 = vmatmul.bf16.vlgmr.msrb.gmra.mxu0 %v4258_v57  ;;  %v3194_v46 = vld [vmem:[#allocation11 + $0x2f0] sm:$0xf] }
 0x1da   : > { %3625 = vtanh.f32 %v1332_v40  ;;  %v1371_v10 = vor.u32 1.1754944e-38, %v1370_v56  ;;  %vm1369_vm1 = vcmp.eq.f32.partialorder %v1368_v55, 8.507059e+37  ;;  %v3063_v48 = vor.u32 %v3409_v34, %v3060_v36  ;;  %2004 = vmatpush.bf16.msrb.mxu2 %v3115_v35  ;;  %v3018_v56 = vld [vmem:[#allocation11 + $0x190] sm:$0xf] }
 0x1db   : > { %v1347_v26 = vmul.f32 %v4327_v39, %v1346_v18  ;;  %v3411_v18 = vld [vmem:[#allocation11 + $0x1f4] sm:$0xf]  ;;  %v3195_v50 = vor.u32 %v3444_v47, %v3194_v46  ;;  %v3127_v35 = vor.u32 %v3425_v31, %v3124_v33  ;;  %v3162_v36 = vld [vmem:[#allocation11 + $0x2b0] sm:$0xf]  ;;  %v3020_v46 = vld [vmem:[#allocation11 + $0x198] sm:$0xf0] }
 0x1dc   : > { %v3071_v21 = vor.u32 %v3411_v18, %v3068_v20  ;;  %v3132_v18 = vld [vmem:[#allocation11 + $0x278] sm:$0xf0]  ;;  %v3170_v20 = vld [vmem:[#allocation11 + $0x2c0] sm:$0xf]  ;;  %v3423_v47 = vld [vmem:[#allocation11 + $0x254] sm:$0xf] }
 0x1dd   : > { %v1348_v44 = vadd.f32 %v4327_v39, %v1347_v26  ;;  %1725 = vmatpush.bf16.msra.mxu3 %v2963_v61  ;;  %v3404_v26 = vld [vmem:[#allocation11 + $0x1b4] sm:$0xf0]  ;;  %v3119_v51 = vor.u32 %v3423_v47, %v3116_v49  ;;  %v3415_v31 = vld [vmem:[#allocation11 + $0x214] sm:$0xf]  ;;  %v3084_v33 = vld [vmem:[#allocation11 + $0x218] sm:$0xf0] }
 0x1de   : > { %v3622_v38 = vpop.eup %3621  ;;  %2030 = vmatpush.bf16.msra.mxu0 %v3071_v21  ;;  %v3035_v29 = vor.u32 %v3404_v26, %v3034_v25  ;;  %2005 = vmatpush.bf16.msrb.mxu2 %v3107_v54  ;;  %v3438_v21 = vld [vmem:[#allocation11 + $0x2c4] sm:$0xf0]  ;;  %v3401_v25 = vld [vmem:[#allocation11 + $0x1a4] sm:$0xf]  ;;  %v3154_v54 = vld [vmem:[#allocation11 + $0x2a0] sm:$0xf] }
 0x1df   : > { %v1360_v42 = vmul.f32 %v3622_v38, %v4330_v2  ;;  %v1352_v59 = vsel %vm1351_vm12, %v4327_v39, %v1348_v44  ;;  %vm1365_vm13 = vweird.f32 %v3622_v38  ;;  %v3624_v1 = vpop.eup %3623  ;;  %v3406_v2 = vld [vmem:[#allocation11 + $0x1c4] sm:$0xf0]  ;;  %v3171_v22 = vor.u32 %v3438_v21, %v3170_v20  ;;  %v3092_v21 = vld [vmem:[#allocation11 + $0x228] sm:$0xf0] }
 0x1e0   : > { %v1357_v0 = vsel %vm1354_vm14, %v1356_v62, %v1352_v59  ;;  %vm1366_vm0 = vmor %vm1364_vm15, %vm1365_vm13  ;;  %v3626_v3 = vpop.eup %3625  ;;  %v3043_v16 = vor.u32 %v3406_v2, %v3042_v8  ;;  %v3400_v59 = vld [vmem:[#allocation11 + $0x194] sm:$0xf0]  ;;  %v3442_v62 = vld [vmem:[#allocation11 + $0x2e4] sm:$0xf0] }
 0x1e1   : > { %v1361_v52 = vsub.f32 1.0, %v1360_v42  ;;  %v1374_v4 = vmul.f32 %v3624_v1, %v1357_v0  ;;  %1726 = vmatpush.bf16.msra.mxu3 %v2955_v24  ;;  %v3402_v42 = vld [vmem:[#allocation11 + $0x1a4] sm:$0xf0]  ;;  %v3019_v61 = vor.u32 %v3400_v59, %v3018_v56  ;;  %v3405_v1 = vld [vmem:[#allocation11 + $0x1c4] sm:$0xf] }
 0x1e2   : > { %1991 = vmatpush.bf16.msrb.mxu1 %v3043_v16  ;;  %2031 = vmatpush.bf16.msra.mxu0 %v3063_v48  ;;  %v3027_v44 = vor.u32 %v3402_v42, %v3026_v41  ;;  %v3418_v8 = vld [vmem:[#allocation11 + $0x224] sm:$0xf0]  ;;  %v3427_v16 = vld [vmem:[#allocation11 + $0x274] sm:$0xf]  ;;  %v3416_v24 = vld [vmem:[#allocation11 + $0x214] sm:$0xf0] }
 0x1e3   : > { %v1362_v60 = vmul.f32 %v3622_v38, %v1361_v52  ;;  %v3407_v52 = vld [vmem:[#allocation11 + $0x1d4] sm:$0xf]  ;;  %v3091_v2 = vor.u32 %v3418_v8, %v3090_v12  ;;  %v3083_v26 = vor.u32 %v3416_v24, %v3082_v23  ;;  %v3436_v48 = vld [vmem:[#allocation11 + $0x2b4] sm:$0xf0]  ;;  %v4354_v42 = vld [vmem:[%s4504_s23] sm:$0x3] }
 0x1e4   : > { %v3055_v55 = vor.u32 %v3407_v52, %v3052_v53  ;;  %v3399_v41 = vld [vmem:[#allocation11 + $0x194] sm:$0xf]  ;;  %v3196_v53 = vld [vmem:[#allocation11 + $0x2f8] sm:$0xf0]  ;;  %v3434_v56 = vld [vmem:[#allocation11 + $0x2a4] sm:$0xf0] }
 0x1e5   : > { %v1363_v9 = vadd.f32 %v3622_v38, %v1362_v60  ;;  %v3186_v60 = vld [vmem:[#allocation11 + $0x2e0] sm:$0xf]  ;;  %v3443_v52 = vld [vmem:[#allocation11 + $0x2f4] sm:$0xf]  ;;  %v3397_v59 = vld [vmem:[#allocation11 + $0x184] sm:$0xf] }
 0x1e6   : > { %1992 = vmatpush.bf16.msrb.mxu1 %v3035_v29  ;;  %2032 = vmatpush.bf16.msra.mxu0 %v3055_v55  ;;  %v3187_v0 = vor.u32 %v3442_v62, %v3186_v60  ;;  %v3028_v29 = vld [vmem:[#allocation11 + $0x1a8] sm:$0xf0]  ;;  %v3199_v55 = vor.u32 %v3443_v52, %v3196_v53 }
 0x1e7   : > { %v1367_v28 = vsel %vm1366_vm0, %v3622_v38, %v1363_v9  ;;  %v3446_v38 = vld [vmem:[#allocation12 + $0x84] sm:$0xf0]  ;;  %v3420_v9 = vld [vmem:[#allocation11 + $0x234] sm:$0xf0]  ;;  %v3031_v34 = vor.u32 %v3401_v25, %v3028_v29  ;;  %v3012_v60 = vld [vmem:[#allocation11 + $0x188] sm:$0xf0] }
 0x1e8   : > { %v1372_v39 = vsel %vm1369_vm1, %v1371_v10, %v1367_v28  ;;  %v2947_v40 = vor.u32 %v3446_v38, %v2946_v37  ;;  %v3099_v10 = vor.u32 %v3420_v9, %v3098_v63  ;;  %v3044_v28 = vld [vmem:[#allocation11 + $0x1c8] sm:$0xf0]  ;;  %v3163_v37 = vor.u32 %v3436_v48, %v3162_v36  ;;  %v3074_v38 = vld [vmem:[#allocation11 + $0x200] sm:$0xf]  ;;  %v3421_v63 = vld [vmem:[#allocation11 + $0x244] sm:$0xf] }
 0x1e9   : > { %v1375_v5 = vmul.f32 %v3626_v3, %v1372_v39  ;;  %v3047_v3 = vor.u32 %v3405_v1, %v3044_v28  ;;  %v3010_v39 = vld [vmem:[#allocation11 + $0x180] sm:$0xf]  ;;  %v3015_v62 = vor.u32 %v3397_v59, %v3012_v60  ;;  %v3108_v9 = vld [vmem:[#allocation11 + $0x248] sm:$0xf0]  ;;  %v1395_v28 = vperm.slane %v4354_v42, 0 }
 0x1ea   : > { %1727 = vmatpush.bf16.msra.mxu3 %v2947_v40  ;;  %1993 = vmatpush.bf16.msrb.mxu1 %v3027_v44  ;;  %v3414_v40 = vld [vmem:[#allocation11 + $0x204] sm:$0xf0]  ;;  %v3188_v1 = vld [vmem:[#allocation11 + $0x2e8] sm:$0xf0]  ;;  %v3435_v36 = vld [vmem:[#allocation11 + $0x2b4] sm:$0xf] }
 0x1eb   : > { %v1376_v6 = vpack.c.bf16 %v1375_v5, %v1374_v4  ;;  %v3398_v4 = vld [vmem:[#allocation11 + $0x184] sm:$0xf0]  ;;  %v3178_v5 = vld [vmem:[#allocation11 + $0x2d0] sm:$0xf]  ;;  %2006 = vmatpush.bf16.msrb.mxu2 %v3099_v10  ;;  %2033 = vmatpush.bf16.msra.mxu0 %v3047_v3  ;;  %v3075_v44 = vor.u32 %v3414_v40, %v3074_v38  ;;  %v3111_v10 = vor.u32 %v3421_v63, %v3108_v9  ;;  %v3172_v23 = vld [vmem:[#allocation11 + $0x2c8] sm:$0xf0] }
 0x1ec   : > { %v3179_v11 = vor.u32 %v3440_v7, %v3178_v5  ;;  %v3100_v7 = vld [vmem:[#allocation11 + $0x238] sm:$0xf0]  ;;  %v3413_v40 = vld [vmem:[#allocation11 + $0x204] sm:$0xf]  ;;  %v3431_v59 = vld [vmem:[#allocation11 + $0x294] sm:$0xf] }
 0x1ed   : > { %1487 = vmatmul.bf16.vlgmr.msra.gmra.mxu1 %v1376_v6  ;;  %1501 = vmatmul.bf16.vlgmr.msra.gmra.mxu2 %v1376_v6  ;;  %v3011_v6 = vor.u32 %v3398_v4, %v3010_v39  ;;  %v3146_v39 = vld [vmem:[#allocation11 + $0x290] sm:$0xf]  ;;  %v3432_v4 = vld [vmem:[#allocation11 + $0x294] sm:$0xf0]  ;;  %v3148_v60 = vld [vmem:[#allocation11 + $0x298] sm:$0xf0] }
 0x1ee   : > { %2016 = vmatpush.bf16.msrb.mxu3 %v3195_v50  ;;  %1994 = vmatpush.bf16.msrb.mxu1 %v3019_v61  ;;  %v3023_v50 = vor.u32 %v3399_v41, %v3020_v46  ;;  %v3155_v61 = vor.u32 %v3434_v56, %v3154_v54  ;;  %v3147_v5 = vor.u32 %v3432_v4, %v3146_v39  ;;  %v3076_v41 = vld [vmem:[#allocation11 + $0x208] sm:$0xf0]  ;;  %v1538_v39 = vld [vmem:[#allocation2 + $0x8] sm:$0x1] }
 0x1ef   : > { %1728 = vmatmul.bf16.vlgmr.msra.gmra.mxu3 %v4258_v57  ;;  %v3135_v57 = vor.u32 %v3427_v16, %v3132_v18  ;;  %2007 = vmatpush.bf16.msrb.mxu2 %v3091_v2  ;;  %v3180_v2 = vld [vmem:[#allocation11 + $0x2d8] sm:$0xf0]  ;;  %v3138_v16 = vld [vmem:[#allocation11 + $0x280] sm:$0xf]  ;;  %v3417_v18 = vld [vmem:[#allocation11 + $0x224] sm:$0xf] }
 0x1f0   : > { %2034 = vmatpush.bf16.msra.mxu0 %v3039_v17  ;;  %v3430_v17 = vld [vmem:[#allocation11 + $0x284] sm:$0xf0]  ;;  %v3095_v24 = vor.u32 %v3417_v18, %v3092_v21  ;;  %v3140_v63 = vld [vmem:[#allocation11 + $0x288] sm:$0xf0] }
 0x1f1   : > { %v3139_v20 = vor.u32 %v3430_v17, %v3138_v16 }
 0x1f2   : > { %2017 = vmatpush.bf16.msrb.mxu3 %v3187_v0  ;;  %1995 = vmatpush.bf16.msrb.mxu1 %v3011_v6  ;;  %v3441_v0 = vld [vmem:[#allocation11 + $0x2e4] sm:$0xf]  ;;  %v3419_v6 = vld [vmem:[#allocation11 + $0x234] sm:$0xf] }
 0x1f3   : > { %2008 = vmatpush.bf16.msrb.mxu2 %v3083_v26  ;;  %v3191_v3 = vor.u32 %v3441_v0, %v3188_v1  ;;  %v3103_v8 = vor.u32 %v3419_v6, %v3100_v7 }
 0x1f4   : > { %2035 = vmatpush.bf16.msra.mxu0 %v3031_v34 }
 0x1f6   : > { %2018 = vmatpush.bf16.msrb.mxu3 %v3179_v11  ;;  %2044 = vmatpush.bf16.msra.mxu1 %v3135_v57  ;;  %v3439_v11 = vld [vmem:[#allocation11 + $0x2d4] sm:$0xf] }
 0x1f7   : > { %2009 = vmatpush.bf16.msrb.mxu2 %v3075_v44  ;;  %v3183_v30 = vor.u32 %v3439_v11, %v3180_v2  ;;  %v3433_v44 = vld [vmem:[#allocation11 + $0x2a4] sm:$0xf] }
 0x1f8   : > { %2036 = vmatpush.bf16.msra.mxu0 %v3023_v50  ;;  %v3156_v50 = vld [vmem:[#allocation11 + $0x2a8] sm:$0xf0] }
 0x1f9   : > { %v3159_v52 = vor.u32 %v3433_v44, %v3156_v50 }
 0x1fa   : > { %2019 = vmatpush.bf16.msrb.mxu3 %v3171_v22  ;;  %2045 = vmatpush.bf16.msra.mxu1 %v3127_v35  ;;  %v3437_v22 = vld [vmem:[#allocation11 + $0x2c4] sm:$0xf]  ;;  %v3087_v35 = vor.u32 %v3415_v31, %v3084_v33 }
 0x1fb   : > { %2058 = vmatpush.bf16.msra.mxu2 %v3199_v55  ;;  %v3175_v25 = vor.u32 %v3437_v22, %v3172_v23  ;;  %v3467_v33 = vld [vmem:[#allocation14 + $0xe4] sm:$0xf] }
 0x1fc   : > { %2037 = vmatpush.bf16.msra.mxu0 %v3015_v62  ;;  %v3429_v62 = vld [vmem:[#allocation11 + $0x284] sm:$0xf] }
 0x1fe   : > { %2020 = vmatpush.bf16.msrb.mxu3 %v3163_v37  ;;  %2046 = vmatpush.bf16.msra.mxu1 %v3119_v51  ;;  %v3079_v51 = vor.u32 %v3413_v40, %v3076_v41  ;;  %v3465_v40 = vld [vmem:[#allocation14 + $0xc4] sm:$0xf]  ;;  %v3220_v41 = vld [vmem:[#allocation14 + $0xc8] sm:$0xf0] }
 0x1ff   : > { %2059 = vmatpush.bf16.msra.mxu2 %v3191_v3 }
 0x202   : > { %2021 = vmatpush.bf16.msrb.mxu3 %v3155_v61  ;;  %2047 = vmatpush.bf16.msra.mxu1 %v3111_v10  ;;  %v3143_v10 = vor.u32 %v3429_v62, %v3140_v63 }
 0x203   : > { %2060 = vmatpush.bf16.msra.mxu2 %v3183_v30 }
 0x206   : > { %2022 = vmatpush.bf16.msrb.mxu3 %v3147_v5  ;;  %2048 = vmatpush.bf16.msra.mxu1 %v3103_v8 }
 0x207   : > { %2061 = vmatpush.bf16.msra.mxu2 %v3175_v25  ;;  %v3468_v25 = vld [vmem:[#allocation14 + $0xf4] sm:$0xf] }
 0x20a   : > { %2023 = vmatpush.bf16.msrb.mxu3 %v3139_v20  ;;  %2049 = vmatpush.bf16.msra.mxu1 %v3095_v24 }
 0x20e   : > { %2050 = vmatpush.bf16.msra.mxu1 %v3087_v35 }
 0x212   : > { %2051 = vmatpush.bf16.msra.mxu1 %v3079_v51  ;;  %v3464_v51 = vld [vmem:[#allocation14 + $0xb4] sm:$0xf] }
 0x256   : > { %v1743_v22 = vpop.f32.mrf.mxu0 }
 0x25e   : > { %v1745_v31 = vpop.f32.mrf.mxu0 }
 0x26a   : > { %v1488_v12 = vpop.f32.mrf.mxu1 }
 0x26b   : > { %v1489_v15 = vadd.f32 %v1488_v12, %v1395_v28 }
 0x26d   : > { %v1507_v57 = vadd.f32 %v1489_v15, %v4265_v58  ;;  %v3164_v58 = vld [vmem:[#allocation11 + $0x2b8] sm:$0xf0] }
 0x26e   : > { %v3167_v38 = vor.u32 %v3435_v36, %v3164_v58 }
 0x26f   : > { %v1509_v26 = vmul.f32 %v1507_v57, %v4262_v45 }
 0x270   : > { %2062 = vmatpush.bf16.msra.mxu2 %v3167_v38  ;;  %v4370_v21 = vpop.f32.mrf.mxu2 }
 0x271   : > { %v1513_v29 = vpack.c.bf16 %v1509_v26, %v1509_v26  ;;  %v3232_v26 = vld [vmem:[#allocation14 + $0xf8] sm:$0xf0] }
 0x272   : > { %v1490_v34 = vpop.f32.mrf.mxu1  ;;  %v1729_v50 = vpop.f32.mrf.mxu3 }
 0x273   : > { %v1516_v48 = vshrl.u32 %v1513_v29, 16  ;;  %v1491_v37 = vadd.f32 %v1490_v34, %v1395_v28  ;;  %v1519_v47 = vshll.u32 %v1513_v29, 16  ;;  %v3235_v29 = vor.u32 %v3468_v25, %v3232_v26  ;;  %v3228_v34 = vld [vmem:[#allocation14 + $0xe8] sm:$0xf0]  ;;  %v3482_v25 = vld [vmem:[#allocation15 + $0x64] sm:$0xf0] }
 0x274   : > { %2063 = vmatpush.bf16.msra.mxu2 %v3159_v52  ;;  %v3231_v58 = vor.u32 %v3467_v33, %v3228_v34  ;;  %v3216_v52 = vld [vmem:[#allocation14 + $0xb8] sm:$0xf0]  ;;  %v3481_v26 = vld [vmem:[#allocation15 + $0x64] sm:$0xf]  ;;  %v3278_v34 = vld [vmem:[#allocation15 + $0x50] sm:$0xf] }
 0x275   : > { %v1518_v46 = vrot.slane %v1516_v48, 7  ;;  %v1508_v49 = vadd.f32 %v1491_v37, %v4276_v19  ;;  %v3151_v19 = vor.u32 %v3431_v59, %v3148_v60  ;;  %2196 = vmatpush.bf16.msra.mxu3 %v3235_v29  ;;  %v3466_v48 = vld [vmem:[#allocation14 + $0xd4] sm:$0xf]  ;;  %v3224_v37 = vld [vmem:[#allocation14 + $0xd8] sm:$0xf0] }
 0x276   : > { %v3227_v38 = vor.u32 %v3466_v48, %v3224_v37  ;;  %v3463_v60 = vld [vmem:[#allocation14 + $0xa4] sm:$0xf]  ;;  %v3288_v29 = vld [vmem:[#allocation15 + $0x68] sm:$0xf0]  ;;  %v3479_v48 = vld [vmem:[#allocation15 + $0x54] sm:$0xf] }
 0x277   : > { %v1521_v53 = vor.u32 %v1519_v47, %v1518_v46  ;;  %v1510_v54 = vmul.f32 %v1508_v49, %v4273_v14  ;;  %v1522_v1 = vrot.slane %v1518_v46, 4  ;;  %v3223_v47 = vor.u32 %v3465_v40, %v3220_v41  ;;  %v3280_v37 = vld [vmem:[#allocation15 + $0x58] sm:$0xf0] }
 0x278   : > { %2064 = vmatpush.bf16.msra.mxu2 %v3151_v19  ;;  %v4374_v24 = vpop.f32.mrf.mxu2  ;;  %v3291_v33 = vor.u32 %v3481_v26, %v3288_v29  ;;  %v3254_v26 = vld [vmem:[#allocation15 + $0x20] sm:$0xf]  ;;  %v3474_v29 = vld [vmem:[#allocation15 + $0x24] sm:$0xf0] }
 0x279   : > { %v1535_v55 = vsel %vm4269_vm2, %v1521_v53, %v4296_v43  ;;  %v1514_v56 = vpack.c.bf16 %v1510_v54, %v1510_v54  ;;  %2197 = vmatpush.bf16.msra.mxu3 %v3231_v58  ;;  %v3219_v53 = vor.u32 %v3464_v51, %v3216_v52  ;;  %v3480_v58 = vld [vmem:[#allocation15 + $0x54] sm:$0xf0]  ;;  %v3270_v51 = vld [vmem:[#allocation15 + $0x40] sm:$0xf]  ;;  %v3478_v52 = vld [vmem:[#allocation15 + $0x44] sm:$0xf0] }
 0x27a   : > { %1536 = vst [vmem:[#allocation2] sm:$0xf] %v1535_v55  ;;  %v4385_v55 = vld [vmem:[%s4457_s7 + $0x2] sm:$0x3]  ;;  %v3279_v41 = vor.u32 %v3480_v58, %v3278_v34  ;;  %v3256_v34 = vld [vmem:[#allocation15 + $0x28] sm:$0xf0] }
 0x27b   : > { %v1524_v61 = vshrl.u32 %v1514_v56, 16  ;;  %v1527_v0 = vshll.u32 %v1514_v56, 16  ;;  %v2076_v59 = vperm.slane %v4385_v55, 1 }
 0x27c   : > { %2065 = vmatpush.bf16.msra.mxu2 %v3143_v10 }
 0x27d   : > { %v1526_v9 = vrot.slane %v1524_v61, 7  ;;  %2198 = vmatpush.bf16.msra.mxu3 %v3227_v38  ;;  %v3212_v61 = vld [vmem:[#allocation14 + $0xa8] sm:$0xf0] }
 0x27e   : > { %v3215_v62 = vor.u32 %v3463_v60, %v3212_v61  ;;  %v3272_v60 = vld [vmem:[#allocation15 + $0x48] sm:$0xf0] }
 0x27f   : > { %v1529_v28 = vor.u32 %v1527_v0, %v1526_v9  ;;  %v1531_v3 = vrot.slane %v1526_v9, 4  ;;  %v3462_v9 = vld [vmem:[#allocation14 + $0x94] sm:$0xf]  ;;  %v3208_v0 = vld [vmem:[#allocation14 + $0x98] sm:$0xf0] }
 0x281   : > { %v1530_v13 = vsel %vm4283_vm6, %v1522_v1, %v1529_v28  ;;  %v1539_v43 = vsel %vm4288_vm7, %v1531_v3, %v1538_v39  ;;  %v3490_v12 = vld [vmem:[#allocation2] sm:$0xe]  ;;  %2199 = vmatpush.bf16.msra.mxu3 %v3223_v47  ;;  %v3211_v1 = vor.u32 %v3462_v9, %v3208_v0  ;;  %v3461_v3 = vld [vmem:[#allocation14 + $0x84] sm:$0xf]  ;;  %v3204_v39 = vld [vmem:[#allocation14 + $0x88] sm:$0xf0] }
 0x282   : > { %1537 = vst [vmem:[#allocation2 + $0x4] sm:$0xf] %v1530_v13 }
 0x283   : > { %1540 = vst [vmem:[#allocation2 + $0x8] sm:$0x1] %v1539_v43  ;;  %v1731_v43 = vpop.f32.mrf.mxu3 }
 0x285   : > { %2200 = vmatpush.bf16.msra.mxu3 %v3219_v53 }
 0x289   : > { %v3486_v4 = vld [vmem:[#allocation2] sm:$0xff]   ;;  %2201 = vmatpush.bf16.msra.mxu3 %v3215_v62 }
 0x28a   : > { %v3489_v5 = vld [vmem:[#allocation2] sm:$0xf0]  ;;  %v1557_v6 = vshll.u32 %v3486_v4, 16  ;;  %1996 = vmatmul.bf16.vlgmr.msrb.gmra.mxu1 %v3486_v4  ;;  %2038 = vmatmul.bf16.vlgmr.msra.gmra.mxu0 %v3486_v4  ;;  %v1543_v7 = vld [vmem:[#allocation2 + $0x8] sm:$0x1]  ;;  %v1555_v30 = vshrl.u32 %v3486_v4, 16 }
 0x28b   : > { %v1552_v8 = vunpack.c.l.b16 %v1543_v7  ;;  %v3491_v11 = vor.u32 %v3490_v12, %v3489_v5 }
 0x28c   : > { %v1559_v2 = vrot.slane %v1557_v6, 1  ;;  %v3207_v6 = vor.u32 %v3461_v3, %v3204_v39 }
 0x28d   : > { %v1553_v15 = vpack.c.b16 %v1552_v8, %v1552_v8  ;;  %v1570_v27 = vrot.slane %v3491_v11, 1  ;;  %2202 = vmatpush.bf16.msra.mxu3 %v3211_v1 }
 0x28e   : > { %v1560_v18 = vor.u32 %v1559_v2, %v1555_v30  ;;  %v3294_v30 = vld [vmem:[#allocation15 + $0x70] sm:$0xf] }
 0x28f   : > { %v1571_v16 = vrot.slane %v1553_v15, 1  ;;  %v1562_v17 = vshll.u32 %v1553_v15, 16 }
 0x291   : > { %v1572_v32 = vsel %vm817_vm8, %v1570_v27, %v1571_v16  ;;  %v1564_v57 = vrot.slane %v1562_v17, 1  ;;  %2203 = vmatpush.bf16.msra.mxu3 %v3207_v6  ;;  %v3484_v27 = vld [vmem:[#allocation15 + $0x74] sm:$0xf0] }
 0x292   : > { %2024 = vmatmul.bf16.vlgmr.msrb.gmra.mxu3 %v1572_v32  ;;  %v3295_v17 = vor.u32 %v3484_v27, %v3294_v30 }
 0x293   : > { %v1565_v20 = vsel %vm800_vm9, %v1560_v18, %v1564_v57  ;;  %v3296_v18 = vld [vmem:[#allocation15 + $0x78] sm:$0xf0] }
 0x294   : > { %2010 = vmatmul.bf16.vlgmr.msrb.gmra.mxu2 %v1565_v20  ;;  %2317 = vmatpush.bf16.msrb.mxu0 %v3295_v17 }
 0x29a   : > { %2052 = vmatmul.bf16.vlgmr.msra.gmra.mxu1 %v1565_v20 }
 0x2a4   : > { %2066 = vmatmul.bf16.vlgmr.msra.gmra.mxu2 %v1572_v32  ;;  %v3483_v32 = vld [vmem:[#allocation15 + $0x74] sm:$0xf] }
 0x2a5   : > { %v3299_v20 = vor.u32 %v3483_v32, %v3296_v18  ;;  %v3262_v32 = vld [vmem:[#allocation15 + $0x30] sm:$0xf]  ;;  %v3476_v18 = vld [vmem:[#allocation15 + $0x34] sm:$0xf0] }
 0x2a7   : > { %2331 = vmatpush.bf16.msrb.mxu1 %v3299_v20  ;;  %v3263_v20 = vor.u32 %v3476_v18, %v3262_v32 }
 0x2ab   : > { %2332 = vmatpush.bf16.msrb.mxu1 %v3291_v33  ;;  %v3255_v33 = vor.u32 %v3474_v29, %v3254_v26 }
 0x307   : > { %v4372_v23 = vpop.f32.mrf.mxu1  ;;  %v2039_v44 = vpop.f32.mrf.mxu0 }
 0x308   : > { %v2040_v54 = vadd.f32 %v2039_v44, %v1743_v22  ;;  %v3286_v22 = vld [vmem:[#allocation15 + $0x60] sm:$0xf]  ;;  %v1998_v38 = vadd.f32 %v4372_v23, %v1729_v50  ;;  %v3271_v23 = vor.u32 %v3478_v52, %v3270_v51  ;;  %v2075_v50 = vperm.slane %v4385_v55, 0  ;;  %v3469_v51 = vld [vmem:[#allocation15 + $0x4] sm:$0xf] }
 0x30f   : > { %v4376_v35 = vpop.f32.mrf.mxu1  ;;  %v2041_v10 = vpop.f32.mrf.mxu0 }
 0x310   : > { %v2042_v4 = vadd.f32 %v2041_v10, %v1745_v31  ;;  %v3287_v31 = vor.u32 %v3482_v25, %v3286_v22  ;;  %v2000_v40 = vadd.f32 %v4376_v35, %v1731_v43  ;;  %v3264_v22 = vld [vmem:[#allocation15 + $0x38] sm:$0xf0] }
 0x312   : > { %2318 = vmatpush.bf16.msrb.mxu0 %v3287_v31  ;;  %v3473_v31 = vld [vmem:[#allocation15 + $0x24] sm:$0xf] }
 0x313   : > { %v3259_v58 = vor.u32 %v3473_v31, %v3256_v34 }
 0x315   : > { %v2025_v57 = vpop.f32.mrf.mxu3 }
 0x316   : > { %2319 = vmatpush.bf16.msrb.mxu0 %v3279_v41  ;;  %v3248_v41 = vld [vmem:[#allocation15 + $0x18] sm:$0xf0] }
 0x317   : > { %v4378_v36 = vpop.f32.mrf.mxu2  ;;  %v2053_v49 = vpop.f32.mrf.mxu1 }
 0x318   : > { %v2054_v56 = vadd.f32 %v2053_v49, %v2040_v54  ;;  %v2012_v47 = vadd.f32 %v4378_v36, %v1998_v38  ;;  %v3283_v49 = vor.u32 %v3479_v48, %v3280_v37  ;;  %v3246_v48 = vld [vmem:[#allocation15 + $0x10] sm:$0xf]  ;;  %v3472_v37 = vld [vmem:[#allocation15 + $0x14] sm:$0xf0]  ;;  %v3471_v38 = vld [vmem:[#allocation15 + $0x14] sm:$0xf] }
 0x31a   : > { %v2026_v35 = vadd.f32 %v2025_v57, %v2012_v47  ;;  %2333 = vmatpush.bf16.msrb.mxu1 %v3283_v49  ;;  %2320 = vmatpush.bf16.msrb.mxu0 %v3271_v23  ;;  %v3475_v57 = vld [vmem:[#allocation15 + $0x34] sm:$0xf]  ;;  %v3238_v47 = vld [vmem:[#allocation15] sm:$0xf]  ;;  %v3470_v49 = vld [vmem:[#allocation15 + $0x4] sm:$0xf0] }
 0x31b   : > { %v3267_v25 = vor.u32 %v3475_v57, %v3264_v22  ;;  %v3239_v52 = vor.u32 %v3470_v49, %v3238_v47 }
 0x31c   : > { %v2079_v0 = vadd.f32 %v2075_v50, %v2026_v35 }
 0x31e   : > { %2321 = vmatpush.bf16.msrb.mxu0 %v3263_v20 }
 0x31f   : > { %v4380_v46 = vpop.f32.mrf.mxu2  ;;  %v2055_v13 = vpop.f32.mrf.mxu1 }
 0x320   : > { %v2056_v7 = vadd.f32 %v2055_v13, %v2042_v4  ;;  %v2014_v54 = vadd.f32 %v4380_v46, %v2000_v40  ;;  %v3247_v40 = vor.u32 %v3472_v37, %v3246_v48 }
 0x322   : > { %2322 = vmatpush.bf16.msrb.mxu0 %v3255_v33 }
 0x326   : > { %2323 = vmatpush.bf16.msrb.mxu0 %v3247_v40 }
 0x327   : > { %v2067_v19 = vpop.f32.mrf.mxu2 }
 0x328   : > { %v2068_v63 = vadd.f32 %v2067_v19, %v2054_v56  ;;  %v2027_v19 = vpop.f32.mrf.mxu3 }
 0x32a   : > { %v2080_v28 = vadd.f32 %v2076_v59, %v2068_v63  ;;  %v2028_v63 = vadd.f32 %v2027_v19, %v2014_v54  ;;  %2324 = vmatpush.bf16.msrb.mxu0 %v3239_v52 }
 0x32c   : > { %v3201_v5 = vmul.f32 -1.442695, %v2080_v28  ;;  %v2081_v10 = vadd.f32 %v2075_v50, %v2028_v63 }
 0x32e   : > { %3627 = vpow2.f32 %v3201_v5 }
 0x32f   : > { %v2069_v12 = vpop.f32.mrf.mxu2 }
 0x330   : > { %v2070_v8 = vadd.f32 %v2069_v12, %v2056_v7 }
 0x332   : > { %v2082_v11 = vadd.f32 %v2076_v59, %v2070_v8  ;;  %v3477_v59 = vld [vmem:[#allocation15 + $0x44] sm:$0xf] }
 0x333   : > { %v3275_v62 = vor.u32 %v3477_v59, %v3272_v60 }
 0x334   : > { %v3628_v2 = vpop.eup %3627  ;;  %v3202_v15 = vmul.f32 -1.442695, %v2082_v11 }
 0x335   : > { %v4388_v16 = vadd.f32 1.0, %v3628_v2  ;;  %2334 = vmatpush.bf16.msrb.mxu1 %v3275_v62 }
 0x336   : > { %3629 = vpow2.f32 %v3202_v15 }
 0x337   : > { %3631 = vrcp.f32 %v4388_v16  ;;  %v2104_v3 = vand.u32 2147483648, %v4388_v16  ;;  %vm2098_vm3 = vweird.f32 %v4388_v16  ;;  %v2102_v55 = vand.u32 2147483647, %v4388_v16 }
 0x339   : > { %v2105_v6 = vor.u32 1.1754944e-38, %v2104_v3  ;;  %vm2103_vm6 = vcmp.eq.f32.partialorder %v2102_v55, 8.507059e+37  ;;  %2335 = vmatpush.bf16.msrb.mxu1 %v3267_v25  ;;  %v2345_v55 = vld [vmem:[%s639_s13] sm:$0xff] }
 0x33c   : > { %v3630_v44 = vpop.eup %3629 }
 0x33d   : > { %v3632_v53 = vpop.eup %3631  ;;  %v2092_v56 = vadd.f32 1.0, %v3630_v44  ;;  %2336 = vmatpush.bf16.msrb.mxu1 %v3259_v58  ;;  %v3251_v44 = vor.u32 %v3471_v38, %v3248_v41 }
 0x33e   : > { %v2094_v61 = vmul.f32 %v3632_v53, %v4388_v16  ;;  %vm2099_vm2 = vweird.f32 %v3632_v53 }
 0x33f   : > { %3633 = vrcp.f32 %v2092_v56  ;;  %vm2100_vm4 = vmor %vm2098_vm3, %vm2099_vm2  ;;  %v2119_v13 = vand.u32 2147483648, %v2092_v56  ;;  %v2117_v5 = vand.u32 2147483647, %v2092_v56  ;;  %vm2113_vm7 = vweird.f32 %v2092_v56 }
 0x340   : > { %v2095_v36 = vsub.f32 1.0, %v2094_v61  ;;  %3635 = vtanh.f32 %v2079_v0  ;;  %v1396_v61 = vperm.slane %v4354_v42, 1  ;;  %v2231_v42 = vld [vmem:[%s4505_s9] sm:$0x3]  ;;  %s3903_s9 = scalar_lea.hbm %s4507_s20, 96 }
 0x341   : > { %3637 = vtanh.f32 %v2081_v10  ;;  %v2120_v8 = vor.u32 1.1754944e-38, %v2119_v13  ;;  %vm2118_vm9 = vcmp.eq.f32.partialorder %v2117_v5, 8.507059e+37  ;;  %2337 = vmatpush.bf16.msrb.mxu1 %v3251_v44  ;;  %v2234_v10 = vperm.slane %v2231_v42, 1  ;;  %p3905_p8 = scmp.lt.s32.totalorder %s3903_s9, %s3899_s4 }
 0x342   : > { %v2096_v9 = vmul.f32 %v3632_v53, %v2095_v36  ;;  %v1503_v35 = vadd.f32 %v4370_v21, %v1396_v61  ;;  %v1505_v19 = vadd.f32 %v4374_v24, %v1396_v61  ;;  %v2233_v21 = vperm.slane %v2231_v42, 0 }
 0x343   : > { %p3906_p5 = por %p3905_p8, %p3904_p9 }
 0x344   : > { %v2097_v28 = vadd.f32 %v3632_v53, %v2096_v9 }
 0x345   : > { %v3634_v46 = vpop.eup %3633  ;;  %p3907_p10 = pnand %p3906_p5, %p3902_p7 }
 0x346   : > { %v2109_v1 = vmul.f32 %v3634_v46, %v2092_v56  ;;  %v2101_v43 = vsel %vm2100_vm4, %v3632_v53, %v2097_v28  ;;  %vm2114_vm5 = vweird.f32 %v3634_v46  ;;  %v3636_v11 = vpop.eup %3635  ;;  %v3240_v53 = vld [vmem:[#allocation15 + $0x8] sm:$0xf0]  ;;  %v3203_v56 = vld [vmem:[%s4504_s23 + $0x2] sm:$0x3] }
 0x347   : > { %v2106_v12 = vsel %vm2103_vm6, %v2105_v6, %v2101_v43  ;;  %vm2115_vm8 = vmor %vm2113_vm7, %vm2114_vm5  ;;  %v3638_v15 = vpop.eup %3637  ;;  %v3243_v54 = vor.u32 %v3469_v51, %v3240_v53  ;;  %v2146_v60 = vperm.slane %v3203_v56, 1 }
 0x348   : > { %v2110_v39 = vsub.f32 1.0, %v2109_v1  ;;  %v2123_v27 = vmul.f32 %v3636_v11, %v2106_v12  ;;  %v2346_v12 = vld [vmem:[%s639_s13 + $0x8] sm:$0xff] }
 0x349   : > { %2338 = vmatpush.bf16.msrb.mxu1 %v3243_v54 }
 0x34a   : > { %v2111_v4 = vmul.f32 %v3634_v46, %v2110_v39 }
 0x34c   : > { %v2112_v7 = vadd.f32 %v3634_v46, %v2111_v4 }
 0x34e   : > { %v2116_v2 = vsel %vm2115_vm8, %v3634_v46, %v2112_v7 }
 0x34f   : > { %v2121_v30 = vsel %vm2118_vm9, %v2120_v8, %v2116_v2 }
 0x350   : > { %v2124_v16 = vmul.f32 %v3638_v15, %v2121_v30 }
 0x352   : > { %v2125_v17 = vpack.c.bf16 %v2124_v16, %v2123_v27 }
 0x354   : > { %2204 = vmatmul.bf16.vlgmr.msra.gmra.mxu3 %v2125_v17 }
 0x3d7   : > { %v2205_v59 = vpop.f32.mrf.mxu3 }
 0x3d8   : > { %v2206_v23 = vadd.f32 %v2205_v59, %v2146_v60 }
 0x3da   : > { %v2210_v36 = vadd.f32 %v2206_v23, %v1503_v35 }
 0x3dc   : > { %v2212_v9 = vmul.f32 %v2210_v36, %v4262_v45 }
 0x3df   : > { %v2207_v50 = vpop.f32.mrf.mxu3 }
 0x3e0   : > { %v2208_v62 = vadd.f32 %v2207_v50, %v2146_v60 }
 0x3e2   : > { %v2211_v63 = vadd.f32 %v2208_v62, %v1505_v19 }
 0x3e4   : > { %v2213_v0 = vmul.f32 %v2211_v63, %v4273_v14 }
 0x3e6   : > { %v2214_v46 = vpack.c.bf16 %v2213_v0, %v2212_v9 }
 0x3e8   : > { %2325 = vmatmul.bf16.vlgmr.msrb.gmra.mxu0 %v2214_v46  ;;  %2339 = vmatmul.bf16.vlgmr.msrb.gmra.mxu1 %v2214_v46 }
 0x465   : > { %v2326_v1 = vpop.f32.mrf.mxu0  ;;  %v2340_v24 = vpop.f32.mrf.mxu1 }
 0x466   : > { %v2327_v28 = vadd.f32 %v2326_v1, %v2233_v21  ;;  %v2341_v3 = vadd.f32 %v2340_v24, %v2234_v10 }
 0x468   : > { %2356 = vst [vmem:[%s629_s29 + $0x8] sm:$0xff] %v2327_v28  ;;  %v2347_v45 = vmul.f32 1.442695, %v2341_v3 }
 0x469   : > { %2357 = vst [vmem:[%s629_s29 + $0x10] sm:$0xff] %v2341_v3 }
 0x46a   : > { %3639 = vpow2.f32 %v2347_v45 }
 0x46d   : > { %v2328_v14 = vpop.f32.mrf.mxu0  ;;  %v2342_v39 = vpop.f32.mrf.mxu1 }
 0x46e   : > { %v2329_v13 = vadd.f32 %v2328_v14, %v2233_v21  ;;  %v2343_v43 = vadd.f32 %v2342_v39, %v2234_v10 }
 0x470   : > { %v3640_v4 = vpop.eup %3639  ;;  %2359 = vst [vmem:[%s629_s29 + $0x20] sm:$0xff] %v2329_v13  ;;  %v2349_v5 = vmul.f32 1.442695, %v2343_v43 }
 0x471   : > { %v2351_v6 = vmul.f32 %v3640_v4, %v2345_v55  ;;  %2360 = vst [vmem:[%s629_s29 + $0x28] sm:$0xff] %v2343_v43 }
 0x472   : > { %3641 = vpow2.f32 %v2349_v5 }
 0x473   : > { %v2353_v7 = vadd.f32 %v2351_v6, %v2327_v28 }
 0x475   : > { %2355 = vst [vmem:[%s629_s29] sm:$0xff] %v2353_v7 }
 0x478   : > { %v3642_v8 = vpop.eup %3641 }
 0x479   : > { %v2352_v11 = vmul.f32 %v3642_v8, %v2346_v12 }
 0x47b   : > { %v2354_v2 = vadd.f32 %v2352_v11, %v2329_v13 }
 0x47d   : > { %2358 = vst [vmem:[%s629_s29 + $0x18] sm:$0xff] %v2354_v2 }
 0x47e   : > { %3910 = shalt.err (!%p3907_p10)
}
 0x47f   : > { %s3982_s5 = smov 384   ;;  %s3983_s29 = smov 24  }
 0x480   : > { %3522 = dma.vmem_to_hbm [thread:$0]  (%p4154_p4), %s2375_s24, 768, %s2377_s30, %s2362_s15, %s3982_s5, %s3982_s5, %s3983_s29  }
 0x481 PF: > { %s2391_s12 = sand.u32 1, %s3957_s25   ;;  %p4508_p11 = scmp.ge.s32.totalorder %s3969_s28, 2 }
 0x482   : > { %s2392_s19 = scalar_lea.sflag [#allocation5], %s2391_s12 }
 0x483   : > { %p3551_p13 = pnand %p4508_p11, %p4158_p6 }
 0x485   : > { %p3552_p0 = pneg %p3551_p13 }
 0x487   : > { %3952 = dma.done.wait (%p3552_p0), %s2392_s19, 768  }
 0x488   : > { %3954 = vsyncadd (%p3552_p0), %s2392_s19, 4294966528  ;;  %s4509_s13 = sld [smem:[#allocation25_spill]]  ;;  %p32_p2 = scmp.ge.s32.totalorder %s4128_s18, 4  }
 0x489   : > { %s4510_s25 = smov %s3961_s26  ;;  %s4511_s26 = smov %s3965_s27 }
 0x48a   : > { %s4513_s28 = smov %s4128_s18  ;;  %34 = sbr.rel (!%p32_p2) target bundleno = 22 (0x16), region = 165 }
 0x48e   : > { %s4512_s27 = smov %s4509_s13 }
 0x48f   :  { %2398 = vsyncpa [#allocation4], 1 }
 0x490   :  { %2400 = vsyncpa [#allocation4 + $0x1], 1 }
 0x491   :  { %2401 = vsyncpa [#allocation7], 1 }
 0x492   :  { %2403 = vsyncpa [#allocation7 + $0x1], 1 }
 0x493   :  { %2404 = vsyncpa [#allocation10], 1 }
 0x494   :  { %2405 = vsyncpa [#allocation13], 1 }
 0x495   :  { %2406 = vsyncpa [#allocation16], 1 }
 0x496   :  { %2407 = vsyncpa [#allocation5], 1 }
 0x497   :  { %2409 = vsyncpa [#allocation5 + $0x1], 1 }

</bundles_post_ra>
